<compile_context>
chip_gen: v7x
topology: tpu7x:2x2x1
jax: 0.10.0
libtpu: 0.0.40
codegen_flags: <defaults>
</compile_context>

<pallas_src>
import jax
import jax.numpy as jnp
from jax import lax
from jax.experimental import pallas as pl
from jax.experimental.pallas import tpu as pltpu


# ---------------------------------------------------------------------------
# Pallas kernel: fused (3x3 conv + bias + ReLU) -> (1x1 conv + bias)
# ---------------------------------------------------------------------------
def _fada_seg_kernel(x_ref, w1_ref, b1_ref, w2_ref, b2_ref, out_ref):
    # x_ref  : (1, H+2, W+2, C_in)   bf16  full zero-padded image for this batch elem
    # w1_ref : (9*C_in, C_feat)      bf16  3x3 taps flattened (ky, kx, c_in) row-major
    # b1_ref : (1, C_feat)           f32
    # w2_ref : (n_cls, C_feat)       bf16  classifier 1x1 conv, pre-transposed
    # b2_ref : (n_cls, 1)            f32
    # out_ref: (1, n_cls, tile_h*W)  f32   NCHW-flattened output block (lane-dense)
    _, hp, wp, c_in = x_ref.shape
    n_cls, m_tile = out_ref.shape[1], out_ref.shape[2]
    w_out = wp - 2
    tile_h = m_tile // w_out

    # Halo row window (tile_h + 2 rows) of this row tile, sliced in VMEM.
    row0 = pl.multiple_of(pl.program_id(1) * tile_h, tile_h)
    slab = x_ref[0, pl.ds(row0, tile_h + 2), :, :]        # (tile_h+2, W+2, C_in)

    # ---- in-VMEM im2col: nine shifted views -> one (m, 9*C_in) patch matrix ----
    # TODO(synk): for widths that are not a multiple of 8 the merge-leading-dims
    # reshape may relayout; pad W in the wrapper if that ever becomes a hot path.
    cols = []
    for ky in range(3):
        for kx in range(3):
            v = slab[ky:ky + tile_h, kx:kx + w_out, :]    # (tile_h, W, C_in) view
            cols.append(v.reshape(m_tile, c_in))          # merge leading dims (cheap)
    patches = jnp.concatenate(cols, axis=-1)              # (m, 9*C_in) bf16

    # ---- feature extractor: single fat-K MXU matmul, f32 bias + ReLU epilogue ----
    feat = jnp.dot(patches, w1_ref[...], preferred_element_type=jnp.float32)
    feat = jnp.maximum(feat + b1_ref[...], 0.0)           # (m, C_feat) f32

    # ---- classifier: 1x1 conv emitted pre-transposed as (n_cls, m) ----
    logits = lax.dot_general(
        w2_ref[...], feat.astype(jnp.bfloat16),
        dimension_numbers=(((1,), (1,)), ((), ())),
        preferred_element_type=jnp.float32)                # (n_cls, m), lane-dense in m
    out_ref[0] = (logits + b2_ref[...]).astype(out_ref.dtype)


# ---------------------------------------------------------------------------
# Tiling heuristics (VMEM-aware, divisor tiles, v7x two-core friendly)
# ---------------------------------------------------------------------------
def _per_step_vmem_bytes(tile_h, h, w, c_in, c_feat, n_cls):
    m = tile_h * w

    def _round8(v):
        return ((v + 7) // 8) * 8

    # Conservative: lane dim padded to 128 for the C_in-minor input block / patches.
    img_block = 2 * (h + 2) * _round8(w + 2) * 128 * 2        # bf16, double-buffered
    slab_val = (tile_h + 2) * _round8(w + 2) * 128 * 2        # in-kernel slab value
    patches = m * max(9 * c_in, 128) * 2                      # bf16 im2col matrix
    feat = m * c_feat * 4                                     # f32 features
    out = 2 * n_cls * m * 4                                   # f32 output, dbl-buffered
    weights = (9 * c_in * c_feat + n_cls * c_feat) * 2 * 2 + (c_feat + n_cls) * 8
    return img_block + slab_val + patches + feat + out + weights


def _choose_row_tiling(n, c_in, h, w, c_feat, n_cls):
    try:
        vmem_cap = int(pltpu.get_tpu_info().vmem_capacity_bytes)
    except Exception:
        vmem_cap = 64 * 1024 * 1024        # v7x per-core capacity (worst case)
    budget = vmem_cap // 3

    divisors = [d for d in range(1, h + 1) if h % d == 0]
    fits = [d for d in divisors
            if _per_step_vmem_bytes(d, h, w, c_in, c_feat, n_cls) <= budget]
    if not fits:
        fits = [divisors[0]]
    if n == 1:
        # Keep >=2 parallel grid steps so both v7x TensorCores get work.
        split = [d for d in fits if d < h]
        if split:
            fits = split
    # Prefer lane-dense output blocks (tile_h*W a multiple of 128, or the full image).
    dense = [d for d in fits if d == h or (d * w) % 128 == 0]
    tile_h = max(dense) if dense else max(fits)
    return tile_h, h // tile_h


# ---------------------------------------------------------------------------
# Wrapper: layout prep (NCHW -> padded bf16 NHWC) + pallas_call
# ---------------------------------------------------------------------------
@jax.jit
def segmentation_model_fada(x_nchw, w1, b1, w2, b2):
    """Forward pass of SegmentationModelFADA.

    x_nchw : (N, C_in, H, W) f32
    w1     : (3, 3, C_in, C_feat)  feature-extractor conv3x3 weights (HWIO)
    b1     : (C_feat,)
    w2     : (C_feat, n_cls)       classifier conv1x1 weights
    b2     : (n_cls,)
    returns (N, n_cls, H, W) logits (NCHW), matching the PyTorch module.
    """
    n, c_in, h, w = x_nchw.shape
    c_feat = w1.shape[-1]
    n_cls = w2.shape[-1]

    tile_h, num_row_tiles = _choose_row_tiling(n, c_in, h, w, c_feat, n_cls)
    m_tile = tile_h * w

    # NCHW -> NHWC, 1-pixel zero halo, bf16 (halves input HBM traffic).  No halo
    # gather, no extra HBM round trip: this padded image IS the kernel input.
    x_nhwc = jnp.transpose(x_nchw, (0, 2, 3, 1))
    x_pad = jnp.pad(x_nhwc, ((0, 0), (1, 1), (1, 1), (0, 0))).astype(jnp.bfloat16)

    w1r = w1.reshape(9 * c_in, c_feat).astype(jnp.bfloat16)   # (ky,kx,ci) row-major
    w2t = jnp.transpose(w2).astype(jnp.bfloat16)              # (n_cls, C_feat)
    b1r = b1.reshape(1, c_feat).astype(jnp.float32)
    b2r = b2.reshape(n_cls, 1).astype(jnp.float32)

    fp = _per_step_vmem_bytes(tile_h, h, w, c_in, c_feat, n_cls)
    vmem_limit = int(min(max(2 * fp + (8 << 20), 16 << 20), 48 << 20))

    flops = 2 * n * h * w * (9 * c_in * c_feat + c_feat * n_cls)
    bytes_accessed = (x_pad.size * 2 + w1r.size * 2 + w2t.size * 2
                      + (b1r.size + b2r.size) * 4 + n * n_cls * h * w * 4)

    out_flat = pl.pallas_call(
        _fada_seg_kernel,
        out_shape=jax.ShapeDtypeStruct((n, n_cls, h * w), jnp.float32),
        grid_spec=pltpu.PrefetchScalarGridSpec(
            num_scalar_prefetch=0,
            grid=(n, num_row_tiles),
            in_specs=[
                # Full padded image per batch element; block index is constant along
                # the row-tile axis so it is DMA'd once per image and re-used.
                pl.BlockSpec((1, h + 2, w + 2, c_in), lambda b, i: (b, 0, 0, 0)),
                pl.BlockSpec((9 * c_in, c_feat), lambda b, i: (0, 0)),     # w1
                pl.BlockSpec((1, c_feat), lambda b, i: (0, 0)),            # b1
                pl.BlockSpec((n_cls, c_feat), lambda b, i: (0, 0)),        # w2^T
                pl.BlockSpec((n_cls, 1), lambda b, i: (0, 0)),             # b2
            ],
            out_specs=pl.BlockSpec((1, n_cls, m_tile), lambda b, i: (b, 0, i)),
        ),
        compiler_params=pltpu.CompilerParams(
            dimension_semantics=("parallel", "parallel"),
            vmem_limit_bytes=vmem_limit,
        ),
        cost_estimate=pl.CostEstimate(
            flops=flops, transcendentals=0, bytes_accessed=bytes_accessed),
    )(x_pad, w1r, b1r, w2t, b2r)

    # Output is already NCHW-flattened and H % tile_h == 0: un-flatten only (free).
    return out_flat.reshape(n, n_cls, h, w)


# ---------------------------------------------------------------------------
# Pure-JAX reference for correctness check
# ---------------------------------------------------------------------------
def _reference(x_nchw, w1, b1, w2, b2):
    x_nhwc = jnp.transpose(x_nchw, (0, 2, 3, 1))
    feat = jax.lax.conv_general_dilated(
        x_nhwc, w1, window_strides=(1, 1), padding="SAME",
        dimension_numbers=("NHWC", "HWIO", "NHWC"))
    feat = jnp.maximum(feat + b1, 0.0)
    logits = jnp.einsum("nhwc,ck->nhwk", feat, w2) + b2
    return jnp.transpose(logits, (0, 3, 1, 2))


if __name__ == "__main__":
    # Small shapes consistent with the module's forward.
    N, C_IN, H, W = 2, 4, 16, 16
    C_FEAT, N_CLS = 32, 8

    key = jax.random.PRNGKey(0)
    kx, kw1, kb1, kw2, kb2 = jax.random.split(key, 5)

    x = jax.random.normal(kx, (N, C_IN, H, W), dtype=jnp.float32)
    w1 = jax.random.normal(kw1, (3, 3, C_IN, C_FEAT), dtype=jnp.float32) * 0.1
    b1 = jax.random.normal(kb1, (C_FEAT,), dtype=jnp.float32) * 0.1
    w2 = jax.random.normal(kw2, (C_FEAT, N_CLS), dtype=jnp.float32) * 0.1
    b2 = jax.random.normal(kb2, (N_CLS,), dtype=jnp.float32) * 0.1

    out = jax.block_until_ready(segmentation_model_fada(x, w1, b1, w2, b2))
    ref = jax.block_until_ready(_reference(x, w1, b1, w2, b2))

    assert out.shape == (N, N_CLS, H, W), out.shape
    max_err = float(jnp.max(jnp.abs(out - ref)))
    # bf16 inputs + bf16 MXU operands with f32 accumulation vs an f32 reference.
    assert max_err < 1e-1, max_err

    print("KERNEL_OK")
</pallas_src>

<mosaic_0001>
module attributes {stable_mosaic.version = 11 : i64} {
  func.func @_fada_seg_kernel(%arg0: i32, %arg1: i32, %arg2: memref<1x18x18x4xbf16, #tpu.memory_space<vmem>>, %arg3: memref<36x32xbf16, #tpu.memory_space<vmem>>, %arg4: memref<1x32xf32, #tpu.memory_space<vmem>>, %arg5: memref<8x32xbf16, #tpu.memory_space<vmem>>, %arg6: memref<8x1xf32, #tpu.memory_space<vmem>>, %arg7: memref<1x8x256xf32, #tpu.memory_space<vmem>>) attributes {dimension_semantics = [#tpu.dimension_semantics<parallel>, #tpu.dimension_semantics<parallel>], iteration_bounds = array<i64: 2, 1>, scalar_prefetch = 0 : i64, scratch_operands = 0 : i64, tpu.core_type = #tpu.core_type<tc>, window_params = [{transform_indices = @transform_0, window_bounds = array<i64: 1, 18, 18, 4>}, {pipeline_mode = #tpu.pipeline_mode<synchronous>, transform_indices = @transform_1, window_bounds = array<i64: 36, 32>}, {pipeline_mode = #tpu.pipeline_mode<synchronous>, transform_indices = @transform_2, window_bounds = array<i64: 1, 32>}, {pipeline_mode = #tpu.pipeline_mode<synchronous>, transform_indices = @transform_3, window_bounds = array<i64: 8, 32>}, {pipeline_mode = #tpu.pipeline_mode<synchronous>, transform_indices = @transform_4, window_bounds = array<i64: 8, 1>}, {transform_indices = @transform_5, window_bounds = array<i64: 1, 8, 256>}]} {
    %c16_i32 = arith.constant 16 : i32
    %0 = arith.muli %arg1, %c16_i32 : i32
    %1 = tpu.assume_multiple %0, 16 : i32
    %c0 = arith.constant 0 : index
    %2 = arith.index_cast %1 : i32 to index
    %c0_0 = arith.constant 0 : index
    %c0_1 = arith.constant 0 : index
    %3 = vector.load %arg2[%c0, %2, %c0_0, %c0_1] : memref<1x18x18x4xbf16, #tpu.memory_space<vmem>>, vector<1x18x18x4xbf16>
    %4 = vector.shape_cast %3 : vector<1x18x18x4xbf16> to vector<18x18x4xbf16>
    %5 = vector.extract_strided_slice %4 {offsets = [0, 0, 0], sizes = [16, 16, 4], strides = [1, 1, 1]} : vector<18x18x4xbf16> to vector<16x16x4xbf16>
    %6 = vector.shape_cast %5 : vector<16x16x4xbf16> to vector<256x4xbf16>
    %7 = vector.extract_strided_slice %4 {offsets = [0, 1, 0], sizes = [16, 16, 4], strides = [1, 1, 1]} : vector<18x18x4xbf16> to vector<16x16x4xbf16>
    %8 = vector.shape_cast %7 : vector<16x16x4xbf16> to vector<256x4xbf16>
    %9 = vector.extract_strided_slice %4 {offsets = [0, 2, 0], sizes = [16, 16, 4], strides = [1, 1, 1]} : vector<18x18x4xbf16> to vector<16x16x4xbf16>
    %10 = vector.shape_cast %9 : vector<16x16x4xbf16> to vector<256x4xbf16>
    %11 = vector.extract_strided_slice %4 {offsets = [1, 0, 0], sizes = [16, 16, 4], strides = [1, 1, 1]} : vector<18x18x4xbf16> to vector<16x16x4xbf16>
    %12 = vector.shape_cast %11 : vector<16x16x4xbf16> to vector<256x4xbf16>
    %13 = vector.extract_strided_slice %4 {offsets = [1, 1, 0], sizes = [16, 16, 4], strides = [1, 1, 1]} : vector<18x18x4xbf16> to vector<16x16x4xbf16>
    %14 = vector.shape_cast %13 : vector<16x16x4xbf16> to vector<256x4xbf16>
    %15 = vector.extract_strided_slice %4 {offsets = [1, 2, 0], sizes = [16, 16, 4], strides = [1, 1, 1]} : vector<18x18x4xbf16> to vector<16x16x4xbf16>
    %16 = vector.shape_cast %15 : vector<16x16x4xbf16> to vector<256x4xbf16>
    %17 = vector.extract_strided_slice %4 {offsets = [2, 0, 0], sizes = [16, 16, 4], strides = [1, 1, 1]} : vector<18x18x4xbf16> to vector<16x16x4xbf16>
    %18 = vector.shape_cast %17 : vector<16x16x4xbf16> to vector<256x4xbf16>
    %19 = vector.extract_strided_slice %4 {offsets = [2, 1, 0], sizes = [16, 16, 4], strides = [1, 1, 1]} : vector<18x18x4xbf16> to vector<16x16x4xbf16>
    %20 = vector.shape_cast %19 : vector<16x16x4xbf16> to vector<256x4xbf16>
    %21 = vector.extract_strided_slice %4 {offsets = [2, 2, 0], sizes = [16, 16, 4], strides = [1, 1, 1]} : vector<18x18x4xbf16> to vector<16x16x4xbf16>
    %22 = vector.shape_cast %21 : vector<16x16x4xbf16> to vector<256x4xbf16>
    %23 = tpu.concatenate %6, %8, %10, %12, %14, %16, %18, %20, %22 in 1 : vector<256x4xbf16>, vector<256x4xbf16>, vector<256x4xbf16>, vector<256x4xbf16>, vector<256x4xbf16>, vector<256x4xbf16>, vector<256x4xbf16>, vector<256x4xbf16>, vector<256x4xbf16> -> vector<256x36xbf16>
    %c0_2 = arith.constant 0 : index
    %c0_3 = arith.constant 0 : index
    %24 = vector.load %arg3[%c0_2, %c0_3] : memref<36x32xbf16, #tpu.memory_space<vmem>>, vector<36x32xbf16>
    %cst = arith.constant dense<0.000000e+00> : vector<256x32xf32>
    %25 = tpu.matmul %23, %24, %cst {dimension_numbers = #tpu.dot_dimension_numbers<[1], [0], [0], [1], [0, 0, 1, 1], [], []>} : vector<256x36xbf16>, vector<36x32xbf16>, vector<256x32xf32> -> vector<256x32xf32>
    %c0_4 = arith.constant 0 : index
    %c0_5 = arith.constant 0 : index
    %26 = vector.load %arg4[%c0_4, %c0_5] : memref<1x32xf32, #tpu.memory_space<vmem>>, vector<1x32xf32>
    %27 = vector.broadcast %26 : vector<1x32xf32> to vector<256x32xf32>
    %28 = arith.addf %25, %27 : vector<256x32xf32>
    %cst_6 = arith.constant 0.000000e+00 : f32
    %29 = vector.broadcast %cst_6 : f32 to vector<256x32xf32>
    %30 = arith.maximumf %28, %29 : vector<256x32xf32>
    %c0_7 = arith.constant 0 : index
    %c0_8 = arith.constant 0 : index
    %31 = vector.load %arg5[%c0_7, %c0_8] : memref<8x32xbf16, #tpu.memory_space<vmem>>, vector<8x32xbf16>
    %32 = arith.truncf %30 : vector<256x32xf32> to vector<256x32xbf16>
    %cst_9 = arith.constant dense<0.000000e+00> : vector<8x256xf32>
    %33 = tpu.matmul %31, %32, %cst_9 {dimension_numbers = #tpu.dot_dimension_numbers<[1], [1], [0], [0], [0, 0, 1, 0], [], []>} : vector<8x32xbf16>, vector<256x32xbf16>, vector<8x256xf32> -> vector<8x256xf32>
    %c0_10 = arith.constant 0 : index
    %c0_11 = arith.constant 0 : index
    %34 = vector.load %arg6[%c0_10, %c0_11] : memref<8x1xf32, #tpu.memory_space<vmem>>, vector<8x1xf32>
    %35 = vector.broadcast %34 : vector<8x1xf32> to vector<8x256xf32>
    %36 = arith.addf %33, %35 : vector<8x256xf32>
    %c0_12 = arith.constant 0 : index
    %c0_13 = arith.constant 0 : index
    %c0_14 = arith.constant 0 : index
    %37 = vector.load %arg7[%c0_12, %c0_13, %c0_14] : memref<1x8x256xf32, #tpu.memory_space<vmem>>, vector<1x8x256xf32>
    %38 = vector.shape_cast %37 : vector<1x8x256xf32> to vector<8x256xf32>
    %39 = vector.shape_cast %36 : vector<8x256xf32> to vector<1x8x256xf32>
    tpu.vector_store %arg7[%c0_12, %c0_13, %c0_14], %39 {strides = array<i32>} : memref<1x8x256xf32, #tpu.memory_space<vmem>>, vector<1x8x256xf32>,
    return
  }
  func.func @transform_0(%arg0: i32, %arg1: i32) -> (i32, i32, i32, i32) {
    %c0_i32 = arith.constant 0 : i32
    %c0_i32_0 = arith.constant 0 : i32
    %c0_i32_1 = arith.constant 0 : i32
    %c0_i32_2 = arith.constant 0 : i32
    return %arg0, %c0_i32, %c0_i32_0, %c0_i32_1 : i32, i32, i32, i32
  }
  func.func @transform_1(%arg0: i32, %arg1: i32) -> (i32, i32) {
    %c0_i32 = arith.constant 0 : i32
    %c0_i32_0 = arith.constant 0 : i32
    %c0_i32_1 = arith.constant 0 : i32
    return %c0_i32, %c0_i32_0 : i32, i32
  }
  func.func @transform_2(%arg0: i32, %arg1: i32) -> (i32, i32) {
    %c0_i32 = arith.constant 0 : i32
    %c0_i32_0 = arith.constant 0 : i32
    %c0_i32_1 = arith.constant 0 : i32
    return %c0_i32, %c0_i32_0 : i32, i32
  }
  func.func @transform_3(%arg0: i32, %arg1: i32) -> (i32, i32) {
    %c0_i32 = arith.constant 0 : i32
    %c0_i32_0 = arith.constant 0 : i32
    %c0_i32_1 = arith.constant 0 : i32
    return %c0_i32, %c0_i32_0 : i32, i32
  }
  func.func @transform_4(%arg0: i32, %arg1: i32) -> (i32, i32) {
    %c0_i32 = arith.constant 0 : i32
    %c0_i32_0 = arith.constant 0 : i32
    %c0_i32_1 = arith.constant 0 : i32
    return %c0_i32, %c0_i32_0 : i32, i32
  }
  func.func @transform_5(%arg0: i32, %arg1: i32) -> (i32, i32, i32) {
    %c0_i32 = arith.constant 0 : i32
    %c0_i32_0 = arith.constant 0 : i32
    return %arg0, %c0_i32, %arg1 : i32, i32, i32
  }
}

</mosaic_0001>

<bundles_post_ra>
// kernel: segmentation_model_fada.1
= control target key start
LH: loop header
LB: loop body
LE: loop exit
PB: predicated region body
PF: predicated region fallthrough
CT: control target
= control target key end

     0   :  { %s2387_s18 = smov 0   ;;  %s2389_s19 = smov 0   ;;  %s3366_s0 = inlined_call_operand.vmem [shape: bf16[2,18,18,4], index: 0, kind: input, shape index: {}]   ;;  %s3367_s1 = inlined_call_operand.vmem [shape: bf16[36,32], index: 1, kind: input, shape index: {}]   ;;  %s3368_s2 = inlined_call_operand.vmem [shape: f32[1,32], index: 2, kind: input, shape index: {}]   ;;  %s3369_s3 = inlined_call_operand.vmem [shape: bf16[8,32], index: 3, kind: input, shape index: {}]   ;;  %s3370_s4 = inlined_call_operand.vmem [shape: f32[8,1], index: 4, kind: input, shape index: {}]   ;;  %s3371_s5 = inlined_call_operand.vmem [shape: f32[2,8,256], index: 5, kind: output, shape index: {}]  }
   0x1   :  { %s2391_s20 = smov 0  }
   0x2 LB: > { %s27_s21 = sadd.s32 1, %s2342_s19  ;;  %p2084_p0 = scmp.ge.s32.totalorder %s2346_s20, 1  ;;  %s2346_s20 = sphi %s2391_s20, %s15_s20   ;;  %s2342_s19 = sphi %s2389_s19, %s3377_s19   ;;  %s2338_s18 = sphi %s2387_s18, %s3376_s18  }
   0x3   : > { %p29_p1 = scmp.ge.s32.totalorder %s27_s21, 2  ;;  %p201_p2 = scmp.lt.s32.totalorder %s2346_s20, 3 }
   0x5   : > { %s3379_s21 = smov (%p29_p1, %s27_s21), 0  ;;  %p202_p3 = pnand %p2084_p0, %p201_p2 }
   0x6   : > { %p233_p4 = scmp.lt.s32.totalorder (!%p202_p3), %s2338_s18, 1  ;;  %vm742_vm0 = vcmask (!%p202_p3), 1042432   ;;  %vm743_vm1 = vcmask (!%p202_p3), 1046532   ;;  %vm307_vm2 = vsmask.f32 (!%p202_p3), 3328  ;;  %s2348_s26 = smov (!%p202_p3), 12  }
   0x7   : > { %205 = sbr.rel (%p202_p3) target bundleno = 850 (0x352), region = 40  ;;  %vm308_vm3 = vsmask.f32 (!%p202_p3), 7440  ;;  %vm2433_vm4 = vmor (!%p202_p3), %vm742_vm0, %vm743_vm1  ;;  %s2349_s27 = smov (!%p202_p3), 20   ;;  %vm1683_vm6 = vcmask (!%p202_p3), 1041408   ;;  %vm1343_vm7 = vcmask (!%p202_p3), 31744  }
   0x8   : > { %vm2468_vm5 = vmor (!%p202_p3), %vm307_vm2, %vm308_vm3  ;;  %s2350_s28 = smov (!%p202_p3), 8   ;;  %s2351_s29 = smov (!%p202_p3), 4   ;;  %vm1392_vm8 = vcmask (!%p202_p3), 64512   ;;  %vm1425_vm9 = vcmask (!%p202_p3), 97280   ;;  %vm1458_vm10 = vcmask (!%p202_p3), 130048   ;;  %vm1491_vm11 = vcmask (!%p202_p3), 162816  }
   0x9   : > { %s2352_s9 = smov (!%p202_p3), 16   ;;  %s2353_s10 = smov (!%p202_p3), 24   ;;  %vm1524_vm12 = vcmask (!%p202_p3), 195584   ;;  %vm1557_vm13 = vcmask (!%p202_p3), 228352   ;;  %vm1590_vm14 = vcmask (!%p202_p3), 261120   ;;  %vm1650_vm15 = vcmask (!%p202_p3), 293888  }
   0xa   : > { %s2354_s11 = smov (!%p202_p3), 28   ;;  %s2355_s12 = smov (!%p202_p3), 32  }
   0xe   : > { %s3381_s18 = smov (!%p233_p4, %s2338_s18), 1 }
   0xf   : > { %s2268_s22 = smul.u32 216, %s3381_s18 }
  0x11   : > { %s2411_s25 = scalar_lea.vmem %s3366_s0, %s2268_s22 }
  0x12   : > { %v2414_v0 = vld [vmem:[%s2411_s25 + $0x18] sm:$0xf]  ;;  %v2417_v1 = vld [vmem:[%s2411_s25 + $0x1c] sm:$0xf]  ;;  %v256_v2 = vld [vmem:[%s2411_s25 + $0xc] sm:$0xf] }
  0x13   : > { %v372_v3 = vshrl.u32 %v2417_v1, 16  ;;  %v2423_v4 = vcombine.low %v2414_v0, %v2417_v1  ;;  %v359_v5 = vshrl.u32 %v2414_v0, 16  ;;  %v362_v6 = vshll.u32 %v2414_v0, 16  ;;  %v257_v7 = vld [vmem:[%s2411_s25 + $0x10] sm:$0xf] }
  0x14   : > { %v344_v8 = vshll.u32 %v257_v7, 16  ;;  %v348_v9 = vshrl.u32 %v257_v7, 16  ;;  %v2428_v10 = vcombine.low %v256_v2, %v257_v7  ;;  %v335_v11 = vshrl.u32 %v256_v2, 16  ;;  %v258_v12 = vld [vmem:[%s2411_s25 + $0x14] sm:$0x1] }
  0x15   : > { %1138 = vrot.lane.b32.xlu1 %v2423_v4, %s2348_s26  ;;  %v338_v14 = vshll.u32 %v256_v2, 16  ;;  %v2089_v15 = vrot.slane %v256_v2, 9  ;;  %v754_v16 = vrot.slane %v257_v7, 5  ;;  %v757_v17 = vrot.slane %v258_v12, 5  ;;  %v2440_v18 = vld [vmem:[%s2411_s25] sm:$0xf] }
  0x16   : > { %v350_v19 = vrot.slane %v348_v9, 4  ;;  %1136 = vrot.lane.b32.xlu0 %v2428_v10, %s2348_s26  ;;  %v337_v20 = vrot.slane %v335_v11, 4  ;;  %v2445_v21 = vld [vmem:[%s2411_s25 + $0x4] sm:$0xf]  ;;  %v255_v22 = vld [vmem:[%s2411_s25 + $0x8] sm:$0x1] }
  0x17   : > { %v340_v23 = vrot.slane %v338_v14, 5  ;;  %v755_v24 = vsel %vm2433_vm4, %v2089_v15, %v754_v16  ;;  %v756_v25 = vrot.slane %v754_v16, 4  ;;  %v2088_v26 = vrot.slane %v2440_v18, 9  ;;  %v261_v35 = vld [vmem:[%s2411_s25 + $0x20] sm:$0x1] }
  0x18   : > { %v747_v27 = vrot.slane %v2445_v21, 5  ;;  %v750_v28 = vrot.slane %v255_v22, 5  ;;  %v311_v29 = vshrl.u32 %v2440_v18, 16  ;;  %v314_v30 = vshll.u32 %v2440_v18, 16  ;;  %v2482_v7 = vld [vmem:[%s2411_s25 + $0x24] sm:$0xf] }
  0x19   : > { %v758_v31 = vsel %vm2433_vm4, %v756_v25, %v757_v17  ;;  %v320_v32 = vshll.u32 %v2445_v21, 16  ;;  %v324_v33 = vshrl.u32 %v2445_v21, 16  ;;  %v330_v34 = vshll.u32 %v255_v22, 16 }
  0x1a   : > { %v2139_v36 = vcombine.low %v755_v24, %v758_v31  ;;  %v748_v37 = vsel %vm2433_vm4, %v2088_v26, %v747_v27  ;;  %v749_v38 = vrot.slane %v747_v27, 4  ;;  %v313_v39 = vrot.slane %v311_v29, 4  ;;  %v264_v26 = vld [vmem:[%s2411_s25 + $0x2c] sm:$0x1] }
  0x1b   : > { %v316_v40 = vrot.slane %v314_v30, 5  ;;  %v322_v41 = vrot.slane %v320_v32, 5  ;;  %v326_v42 = vrot.slane %v324_v33, 4  ;;  %v332_v43 = vrot.slane %v330_v34, 5  ;;  %v2315_v34 = vld [vmem:[%s3367_s1 + $0x8] sm:$0xff]  }
  0x1c   : > { %1206 = vrot.lane.b32.xlu0 %v2139_v36, %s2349_s27  ;;  %v751_v44 = vsel %vm2433_vm4, %v749_v38, %v750_v28  ;;  %v2090_v45 = vrot.slane %v2414_v0, 9  ;;  %v761_v46 = vrot.slane %v2417_v1, 5  ;;  %v764_v47 = vrot.slane %v261_v35, 5 }
  0x1d   : > { %v2138_v48 = vcombine.low %v748_v37, %v751_v44  ;;  %v317_v49 = vor.u32 %v316_v40, %v313_v39  ;;  %v327_v50 = vor.u32 %v326_v42, %v322_v41  ;;  %v341_v51 = vor.u32 %v340_v23, %v337_v20 }
  0x1e   : > { %v762_v53 = vsel %vm2433_vm4, %v2090_v45, %v761_v46  ;;  %v763_v54 = vrot.slane %v761_v46, 4  ;;  %v346_v55 = vrot.slane %v344_v8, 5  ;;  %v354_v56 = vshll.u32 %v258_v12, 16  ;;  %v2493_v12 = vld [vmem:[%s2411_s25 + $0x28] sm:$0xf] }
  0x1f   : > { %1101 = vrot.lane.b32.xlu1 %v2138_v48, %s2350_s28  ;;  %v318_v57 = vrot.slane %v317_v49, 4  ;;  %v328_v58 = vrot.slane %v327_v50, 4  ;;  %v342_v59 = vrot.slane %v341_v51, 4  ;;  %v361_v60 = vrot.slane %v359_v5, 4  ;;  %v265_v49 = vld [vmem:[%s2411_s25 + $0x30] sm:$0xf] }
  0x20   : > { %v765_v61 = vsel %vm2433_vm4, %v763_v54, %v764_v47  ;;  %v351_v62 = vor.u32 %v350_v19, %v346_v55  ;;  %v356_v63 = vrot.slane %v354_v56, 5  ;;  %v364_v2 = vrot.slane %v362_v6, 5  ;;  %v266_v50 = vld [vmem:[%s2411_s25 + $0x34] sm:$0xf] }
  0x21   : > { %v323_v8 = vsel %vm2468_vm5, %v318_v57, %v322_v41  ;;  %v333_v9 = vsel %vm2468_vm5, %v328_v58, %v332_v43  ;;  %v2488_v11 = vcombine.low %v762_v53, %v765_v61  ;;  %v347_v5 = vsel %vm2468_vm5, %v342_v59, %v346_v55 }
  0x22   : > { %v2122_v14 = vcombine.low %v323_v8, %v333_v9  ;;  %v352_v15 = vrot.slane %v351_v62, 4  ;;  %v365_v0 = vor.u32 %v364_v2, %v361_v60  ;;  %v368_v6 = vshll.u32 %v2417_v1, 16  ;;  %v2313_v1 = vld [vmem:[%s3367_s1] sm:$0xff]   ;;  %v267_v62 = vld [vmem:[%s2411_s25 + $0x38] sm:$0x1] }
  0x23   : > { %1103 = vrot.lane.b32.xlu1 %v2139_v36, %s2350_s28  ;;  %v374_v16 = vrot.slane %v372_v3, 4  ;;  %v378_v17 = vshll.u32 %v261_v35, 16  ;;  %v383_v19 = vshrl.u32 %v2482_v7, 16  ;;  %v386_v20 = vshll.u32 %v2482_v7, 16  ;;  %2221 = vmatprep.subr.bf16.mxu0 %v2313_v1 }
  0x24   : > { %1021 = vrot.lane.b32.xlu0 %v2122_v14, %s2351_s29  ;;  %v357_v22 = vsel %vm2468_vm5, %v352_v15, %v356_v63  ;;  %v366_v23 = vrot.slane %v365_v0, 4  ;;  %v370_v24 = vrot.slane %v368_v6, 5  ;;  %v396_v25 = vshrl.u32 %v2493_v12, 16  ;;  %2222 = vmatpush3.bf16.msra.mxu0 %v2313_v1  ;;  %v2549_v15 = vld [vmem:[%s2411_s25 + $0x3c] sm:$0xf] }
  0x25   : > { %v2123_v3 = vcombine.low %v347_v5, %v357_v22  ;;  %v385_v27 = vrot.slane %v383_v19, 4  ;;  %v380_v29 = vrot.slane %v378_v17, 5  ;;  %v388_v30 = vrot.slane %v386_v20, 5  ;;  %2223 = vmatprep.subr.bf16.mxu0 %v2315_v34  ;;  %v269_v0 = vld [vmem:[%s2411_s25 + $0x40] sm:$0xf] }
  0x26   : > { %v375_v28 = vor.u32 %v374_v16, %v370_v24  ;;  %v392_v31 = vshll.u32 %v2493_v12, 16  ;;  %v398_v32 = vrot.slane %v396_v25, 4  ;;  %v402_v33 = vshll.u32 %v264_v26, 16 }
  0x27   : > { %1208 = vrot.lane.b32.xlu1 %v2488_v11, %s2349_s27  ;;  %v371_v35 = vsel %vm2468_vm5, %v366_v23, %v370_v24  ;;  %v389_v37 = vor.u32 %v388_v30, %v385_v27  ;;  %v2524_v45 = vcombine.low %v2482_v7, %v2493_v12  ;;  %v768_v46 = vrot.slane %v2493_v12, 5 }
  0x28   : > { %1023 = vrot.lane.b32.xlu0 %v2123_v3, %s2351_s29  ;;  %v376_v36 = vrot.slane %v375_v28, 4  ;;  %v394_v38 = vrot.slane %v392_v31, 5  ;;  %v404_v42 = vrot.slane %v402_v33, 5  ;;  %2224 = vmatpush3.bf16.msra.mxu0 %v2315_v34  ;;  %v2091_v53 = vrot.slane %v2482_v7, 9  ;;  %v270_v33 = vld [vmem:[%s2411_s25 + $0x44] sm:$0x1] }
  0x29   : > { %v390_v40 = vrot.slane %v389_v37, 4  ;;  %v770_v54 = vrot.slane %v768_v46, 4  ;;  %v771_v55 = vrot.slane %v264_v26, 5  ;;  %v407_v56 = vshrl.u32 %v265_v49, 16 }
  0x2a   : > { %v381_v39 = vsel %vm2468_vm5, %v376_v36, %v380_v29  ;;  %v399_v41 = vor.u32 %v398_v32, %v394_v38  ;;  %v410_v57 = vshll.u32 %v265_v49, 16  ;;  %v420_v58 = vshrl.u32 %v266_v50, 16 }
  0x2b   : > { %v2124_v43 = vcombine.low %v371_v35, %v381_v39  ;;  %v395_v47 = vsel %vm2468_vm5, %v390_v40, %v394_v38  ;;  %v416_v59 = vshll.u32 %v266_v50, 16  ;;  %v769_v60 = vsel %vm2433_vm4, %v2091_v53, %v768_v46 }
  0x2c   : > { %1171 = vrot.lane.b32.xlu0 %v2123_v3, %s2352_s9  ;;  %v400_v44 = vrot.slane %v399_v41, 4  ;;  %v772_v61 = vsel %vm2433_vm4, %v770_v54, %v771_v55  ;;  %v409_v63 = vrot.slane %v407_v56, 4  ;;  %v412_v2 = vrot.slane %v410_v57, 5 }
  0x2d   : > { %1173 = vrot.lane.b32.xlu1 %v2124_v43, %s2352_s9  ;;  %v418_v7 = vrot.slane %v416_v59, 5  ;;  %v422_v8 = vrot.slane %v420_v58, 4  ;;  %v2141_v9 = vcombine.low %v769_v60, %v772_v61  ;;  %v426_v5 = vshll.u32 %v267_v62, 16  ;;  %v2316_v60 = vld [vmem:[%s3367_s1 + $0x10] ss:$0 sps:$4 sm:$0x33]  }
  0x2e   : > { %v405_v48 = vsel %vm2468_vm5, %v400_v44, %v404_v42  ;;  %v413_v12 = vor.u32 %v412_v2, %v409_v63  ;;  %v775_v16 = vrot.slane %v266_v50, 5  ;;  %v431_v17 = vshrl.u32 %v2549_v15, 16  ;;  %v273_v2 = vld [vmem:[%s2411_s25 + $0x50] sm:$0x1]  ;;  %2259 = vmatprep.subr.msk.bf16.mxu0 %vm1683_vm6, %v2316_v60 }
  0x2f   : > { %v2125_v51 = vcombine.low %v395_v47, %v405_v48  ;;  %v423_v14 = vor.u32 %v422_v8, %v418_v7  ;;  %v428_v6 = vrot.slane %v426_v5, 5  ;;  %v434_v19 = vshll.u32 %v2549_v15, 16 }
  0x30   : > { %1241 = vrot.lane.b32.xlu0 %v2423_v4, %s2353_s10  ;;  %v414_v20 = vrot.slane %v413_v12, 4  ;;  %v444_v23 = vshrl.u32 %v269_v0, 16  ;;  %v440_v24 = vshll.u32 %v269_v0, 16  ;;  %v2558_v25 = vcombine.low %v265_v49, %v266_v50  ;;  %v272_v50 = vld [vmem:[%s2411_s25 + $0x4c] sm:$0xf] }
  0x31   : > { %1243 = vrot.lane.b32.xlu1 %v2524_v45, %s2353_s10  ;;  %v424_v22 = vrot.slane %v423_v14, 4  ;;  %v2092_v26 = vrot.slane %v265_v49, 9  ;;  %v777_v1 = vrot.slane %v775_v16, 4  ;;  %v778_v3 = vrot.slane %v267_v62, 5  ;;  %v271_v49 = vld [vmem:[%s2411_s25 + $0x48] sm:$0xf] }
  0x32   : > { %v433_v27 = vrot.slane %v431_v17, 4  ;;  %v436_v28 = vrot.slane %v434_v19, 5  ;;  %v419_v29 = vsel %vm2468_vm5, %v414_v20, %v418_v7  ;;  %v442_v31 = vrot.slane %v440_v24, 5 }
  0x33   : > { %v429_v30 = vsel %vm2468_vm5, %v424_v22, %v428_v6  ;;  %v446_v32 = vrot.slane %v444_v23, 4  ;;  %v776_v34 = vsel %vm2433_vm4, %v2092_v26, %v775_v16  ;;  %v779_v35 = vsel %vm2433_vm4, %v777_v1, %v778_v3  ;;  %v274_v6 = vld [vmem:[%s2411_s25 + $0x54] sm:$0xf]  ;;  %v275_v16 = vld [vmem:[%s2411_s25 + $0x58] sm:$0xf] }
  0x34   : > { %1276 = vrot.lane.b32.xlu0 %v2124_v43, %s2354_s11  ;;  %v437_v36 = vor.u32 %v436_v28, %v433_v27  ;;  %v450_v38 = vshll.u32 %v270_v33, 16  ;;  %v2142_v39 = vcombine.low %v776_v34, %v779_v35  ;;  %v782_v44 = vrot.slane %v269_v0, 5  ;;  %v276_v35 = vld [vmem:[%s2411_s25 + $0x5c] sm:$0x1] }
  0x35   : > { %1278 = vrot.lane.b32.xlu1 %v2125_v51, %s2354_s11  ;;  %v447_v37 = vor.u32 %v446_v32, %v442_v31  ;;  %v2106_v46 = vcombine.low %v2440_v18, %v2445_v21  ;;  %v785_v55 = vrot.slane %v270_v33, 5  ;;  %v455_v56 = vshrl.u32 %v271_v49, 16 }
  0x36   : > { %v438_v40 = vrot.slane %v437_v36, 4  ;;  %v452_v42 = vrot.slane %v450_v38, 5  ;;  %v784_v54 = vrot.slane %v782_v44, 4  ;;  %v458_v57 = vshll.u32 %v271_v49, 16 }
  0x37   : > { %v448_v41 = vrot.slane %v447_v37, 4  ;;  %v468_v58 = vshrl.u32 %v272_v50, 16  ;;  %v464_v59 = vshll.u32 %v272_v50, 16  ;;  %v457_v63 = vrot.slane %v455_v56, 4 }
  0x38   : > { %1311 = vrot.lane.b32.xlu0 %v2488_v11, %s2355_s12  ;;  %v443_v47 = vsel %vm2468_vm5, %v438_v40, %v442_v31  ;;  %v786_v62 = vsel %vm2433_vm4, %v784_v54, %v785_v55  ;;  %v460_v7 = vrot.slane %v458_v57, 5  ;;  %v1685_v12 = vsel %vm1683_vm6, %v2316_v60, 0  ;;  %v278_v55 = vld [vmem:[%s2411_s25 + $0x64] sm:$0xf] }
  0x39   : > { %1025 = vrot.lane.b32.xlu1 %v2124_v43, %s2351_s29  ;;  %v2579_v43 = vcombine.low %v2549_v15, %v269_v0  ;;  %v453_v48 = vsel %vm2468_vm5, %v448_v41, %v452_v42  ;;  %v466_v8 = vrot.slane %v464_v59, 5  ;;  %v474_v14 = vshll.u32 %v273_v2, 16  ;;  %2226 = vmatpush3.bf16.msra.mxu0 %v1685_v12 }
  0x3a   : > { %v2127_v53 = vcombine.low %v443_v47, %v453_v48  ;;  %v789_v19 = vrot.slane %v272_v50, 5  ;;  %v479_v20 = vshrl.u32 %v274_v6, 16  ;;  %v482_v22 = vshll.u32 %v274_v6, 16 }
  0x3b   : > { %v476_v17 = vrot.slane %v474_v14, 5  ;;  %v492_v26 = vshrl.u32 %v275_v16, 16  ;;  %v488_v1 = vshll.u32 %v275_v16, 16  ;;  %v2611_v3 = vcombine.low %v271_v49, %v272_v50 }
  0x3c   : > { %1313 = vrot.lane.b32.xlu0 %v2141_v9, %s2355_s12  ;;  %v2094_v27 = vrot.slane %v271_v49, 9  ;;  %v791_v28 = vrot.slane %v789_v19, 4  ;;  %v484_v31 = vrot.slane %v482_v22, 5  ;;  %v498_v41 = vshll.u32 %v276_v35, 16 }
  0x3d   : > { %1027 = vrot.lane.b32.xlu1 %v2125_v51, %s2351_s29  ;;  %v494_v34 = vrot.slane %v492_v26, 4  ;;  %v2631_v49 = vcombine.low %v274_v6, %v275_v16  ;;  %v796_v50 = vrot.slane %v275_v16, 5  ;;  %v2095_v56 = vrot.slane %v274_v6, 9 }
  0x3e   : > { %v790_v37 = vsel %vm2433_vm4, %v2094_v27, %v789_v19  ;;  %v500_v48 = vrot.slane %v498_v41, 5  ;;  %v799_v57 = vrot.slane %v276_v35, 5  ;;  %v2656_v19 = vld [vmem:[%s2411_s25 + $0x70] sm:$0xf] }
  0x3f   : > { %v798_v59 = vrot.slane %v796_v50, 4  ;;  %v540_v27 = vshrl.u32 %v2656_v19, 16 }
  0x40   : > { %1105 = vrot.lane.b32.xlu0 %v2488_v11, %s2350_s28  ;;  %v2126_v11 = vcombine.low %v419_v29, %v429_v30  ;;  %v792_v29 = vrot.slane %v273_v2, 5  ;;  %v481_v30 = vrot.slane %v479_v20, 4  ;;  %v797_v2 = vsel %vm2433_vm4, %v2095_v56, %v796_v50 }
  0x41   : > { %1107 = vrot.lane.b32.xlu1 %v2141_v9, %s2350_s28 }
  0x42   : > { %v793_v38 = vsel %vm2433_vm4, %v791_v28, %v792_v29  ;;  %v536_v28 = vshll.u32 %v2656_v19, 16 }
  0x43   : > { %v2144_v42 = vcombine.low %v790_v37, %v793_v38  ;;  %v542_v37 = vrot.slane %v540_v27, 4  ;;  %v282_v38 = vld [vmem:[%s2411_s25 + $0x74] sm:$0x1] }
  0x44   : > { %1140 = vrot.lane.b32.xlu0 %v2524_v45, %s2348_s26 }
  0x45   : > { %1142 = vrot.lane.b32.xlu1 %v2558_v25, %s2348_s26 }
  0x48   : > { %1175 = vrot.lane.b32.xlu0 %v2125_v51, %s2352_s9  ;;  %v2093_v51 = vrot.slane %v2549_v15, 9  ;;  %v461_v15 = vor.u32 %v460_v7, %v457_v63  ;;  %v512_v63 = vshll.u32 %v278_v55, 16  ;;  %v800_v7 = vsel %vm2433_vm4, %v798_v59, %v799_v57 }
  0x49   : > { %1177 = vrot.lane.b32.xlu1 %v2126_v11, %s2352_s9  ;;  %v810_v57 = vrot.slane %v2656_v19, 5 }
  0x4a   : > { %v783_v61 = vsel %vm2433_vm4, %v2093_v51, %v782_v44  ;;  %v462_v23 = vrot.slane %v461_v15, 4  ;;  %v514_v12 = vrot.slane %v512_v63, 5  ;;  %v2145_v15 = vcombine.low %v797_v2, %v800_v7 }
  0x4b   : > { %v2143_v5 = vcombine.low %v783_v61, %v786_v62  ;;  %v516_v62 = vshrl.u32 %v278_v55, 16  ;;  %v813_v2 = vrot.slane %v282_v38, 5 }
  0x4c   : > { %1210 = vrot.lane.b32.xlu0 %v2141_v9, %s2349_s27  ;;  %v470_v9 = vrot.slane %v468_v58, 4  ;;  %v467_v32 = vsel %vm2468_vm5, %v462_v23, %v466_v8  ;;  %v803_v23 = vrot.slane %v278_v55, 5 }
  0x4d   : > { %1212 = vrot.lane.b32.xlu1 %v2142_v39, %s2349_s27  ;;  %v518_v14 = vrot.slane %v516_v62, 4 }
  0x4e   : > { %v471_v0 = vor.u32 %v470_v9, %v466_v8 }
  0x4f   : > { %v519_v16 = vor.u32 %v518_v14, %v514_v12 }
  0x50   : > { %1245 = vrot.lane.b32.xlu0 %v2558_v25, %s2353_s10  ;;  %v472_v24 = vrot.slane %v471_v0, 4 }
  0x51   : > { %1247 = vrot.lane.b32.xlu1 %v2579_v43, %s2353_s10  ;;  %v520_v26 = vrot.slane %v519_v16, 4 }
  0x52   : > { %v477_v33 = vsel %vm2468_vm5, %v472_v24, %v476_v17  ;;  %v2653_v17 = vld [vmem:[%s2411_s25 + $0x6c] sm:$0xf] }
  0x53   : > { %v2128_v36 = vcombine.low %v467_v32, %v477_v33  ;;  %v527_v24 = vshrl.u32 %v2653_v17, 16  ;;  %v805_v32 = vrot.slane %v803_v23, 4  ;;  %v2694_v56 = vcombine.low %v2653_v17, %v2656_v19 }
  0x54   : > { %1280 = vrot.lane.b32.xlu0 %v2126_v11, %s2354_s11  ;;  %v2097_v63 = vrot.slane %v2653_v17, 9 }
  0x55   : > { %1282 = vrot.lane.b32.xlu1 %v2127_v53, %s2354_s11 }
  0x58   : > { %1315 = vrot.lane.b32.xlu0 %v2142_v39, %s2355_s12 }
  0x59   : > { %1029 = vrot.lane.b32.xlu1 %v2126_v11, %s2351_s29  ;;  %v490_v11 = vrot.slane %v488_v1, 5  ;;  %v530_v1 = vshll.u32 %v2653_v17, 16 }
  0x5b   : > { %v495_v40 = vor.u32 %v494_v34, %v490_v11  ;;  %v532_v35 = vrot.slane %v530_v1, 5 }
  0x5c   : > { %1317 = vrot.lane.b32.xlu0 %v2143_v5, %s2355_s12 }
  0x5d   : > { %1031 = vrot.lane.b32.xlu1 %v2127_v53, %s2351_s29  ;;  %v496_v47 = vrot.slane %v495_v40, 4 }
  0x5f   : > { %v501_v54 = vsel %vm2468_vm5, %v496_v47, %v500_v48  ;;  %v546_v47 = vshll.u32 %v282_v38, 16 }
  0x60   : > { %1109 = vrot.lane.b32.xlu0 %v2142_v39, %s2350_s28  ;;  %v485_v39 = vor.u32 %v484_v31, %v481_v30 }
  0x61   : > { %1111 = vrot.lane.b32.xlu1 %v2143_v5, %s2350_s28 }
  0x62   : > { %v486_v44 = vrot.slane %v485_v39, 4 }
  0x64   : > { %1144 = vrot.lane.b32.xlu0 %v2579_v43, %s2348_s26  ;;  %v491_v51 = vsel %vm2468_vm5, %v486_v44, %v490_v11  ;;  %v529_v11 = vrot.slane %v527_v24, 4 }
  0x65   : > { %1146 = vrot.lane.b32.xlu1 %v2611_v3, %s2348_s26  ;;  %v2129_v58 = vcombine.low %v491_v51, %v501_v54 }
  0x68   : > { %1179 = vrot.lane.b32.xlu0 %v2127_v53, %s2352_s9  ;;  %v277_v53 = vld [vmem:[%s2411_s25 + $0x60] sm:$0xf] }
  0x69   : > { %1181 = vrot.lane.b32.xlu1 %v2128_v36, %s2352_s9  ;;  %v503_v60 = vshrl.u32 %v277_v53, 16  ;;  %v506_v61 = vshll.u32 %v277_v53, 16  ;;  %v2665_v29 = vcombine.low %v277_v53, %v278_v55  ;;  %v2096_v30 = vrot.slane %v277_v53, 9 }
  0x6a   : > { %v548_v53 = vrot.slane %v546_v47, 5 }
  0x6b   : > { %v505_v8 = vrot.slane %v503_v60, 4  ;;  %v508_v9 = vrot.slane %v506_v61, 5  ;;  %v804_v40 = vsel %vm2433_vm4, %v2096_v30, %v803_v23  ;;  %v2702_v60 = vld [vmem:[%s2411_s25 + $0x78] sm:$0xf]  ;;  %v2705_v61 = vld [vmem:[%s2411_s25 + $0x7c] sm:$0xf] }
  0x6c   : > { %1214 = vrot.lane.b32.xlu0 %v2143_v5, %s2349_s27  ;;  %v279_v5 = vld [vmem:[%s2411_s25 + $0x68] sm:$0x1]  ;;  %v564_v14 = vshrl.u32 %v2705_v61, 16  ;;  %v2760_v18 = vcombine.low %v2702_v60, %v2705_v61  ;;  %v2098_v21 = vrot.slane %v2702_v60, 9 }
  0x6d   : > { %1216 = vrot.lane.b32.xlu1 %v2144_v42, %s2349_s27  ;;  %v509_v0 = vor.u32 %v508_v9, %v505_v8  ;;  %v522_v6 = vshll.u32 %v279_v5, 16  ;;  %v806_v33 = vrot.slane %v279_v5, 5  ;;  %v812_v9 = vrot.slane %v810_v57, 4 }
  0x6e   : > { %v551_v5 = vshrl.u32 %v2702_v60, 16  ;;  %v566_v24 = vrot.slane %v564_v14, 4 }
  0x6f   : > { %v510_v20 = vrot.slane %v509_v0, 4  ;;  %v524_v22 = vrot.slane %v522_v6, 5  ;;  %v807_v41 = vsel %vm2433_vm4, %v805_v32, %v806_v33  ;;  %v811_v6 = vsel %vm2433_vm4, %v2097_v63, %v810_v57  ;;  %v2736_v32 = vld [vmem:[%s2411_s25 + $0x84] sm:$0xf]  ;;  %v2739_v33 = vld [vmem:[%s2411_s25 + $0x88] sm:$0xf] }
  0x70   : > { %1249 = vrot.lane.b32.xlu0 %v2611_v3, %s2353_s10  ;;  %v2683_v48 = vcombine.low %v804_v40, %v807_v41  ;;  %v814_v16 = vsel %vm2433_vm4, %v812_v9, %v813_v2  ;;  %v553_v17 = vrot.slane %v551_v5, 4  ;;  %v588_v41 = vshrl.u32 %v2739_v33, 16  ;;  %v288_v2 = vld [vmem:[%s2411_s25 + $0x8c] sm:$0x1] }
  0x71   : > { %1251 = vrot.lane.b32.xlu1 %v2631_v49, %s2353_s10  ;;  %v515_v31 = vsel %vm2468_vm5, %v510_v20, %v514_v12  ;;  %v525_v34 = vsel %vm2468_vm5, %v520_v26, %v524_v22  ;;  %v554_v12 = vshll.u32 %v2702_v60, 16  ;;  %v285_v22 = vld [vmem:[%s2411_s25 + $0x80] sm:$0x1]  ;;  %v2730_v26 = vcombine.low %v811_v6, %v814_v16 }
  0x72   : > { %v2130_v39 = vcombine.low %v515_v31, %v525_v34  ;;  %v594_v16 = vshll.u32 %v288_v2, 16 }
  0x73   : > { %v556_v19 = vrot.slane %v554_v12, 5 }
  0x74   : > { %1284 = vrot.lane.b32.xlu0 %v2128_v36, %s2354_s11 }
  0x75   : > { %1286 = vrot.lane.b32.xlu1 %v2129_v58, %s2354_s11  ;;  %v557_v27 = vor.u32 %v556_v19, %v553_v17 }
  0x77   : > { %v558_v34 = vrot.slane %v557_v27, 4 }
  0x78   : > { %1319 = vrot.lane.b32.xlu0 %v2144_v42, %s2355_s12 }
  0x79   : > { %1033 = vrot.lane.b32.xlu1 %v2128_v36, %s2351_s29  ;;  %v538_v36 = vrot.slane %v536_v28, 5  ;;  %v570_v28 = vshll.u32 %v285_v22, 16 }
  0x7b   : > { %v543_v44 = vor.u32 %v542_v37, %v538_v36  ;;  %v578_v37 = vshll.u32 %v2736_v32, 16 }
  0x7c   : > { %1321 = vrot.lane.b32.xlu0 %v2145_v15, %s2355_s12 }
  0x7d   : > { %1035 = vrot.lane.b32.xlu1 %v2129_v58, %s2351_s29  ;;  %v544_v54 = vrot.slane %v543_v44, 4 }
  0x7f   : > { %v549_v59 = vsel %vm2468_vm5, %v544_v54, %v548_v53 }
  0x80   : > { %1113 = vrot.lane.b32.xlu0 %v2144_v42, %s2350_s28  ;;  %v533_v42 = vor.u32 %v532_v35, %v529_v11  ;;  %v817_v11 = vrot.slane %v2705_v61, 5  ;;  %v572_v35 = vrot.slane %v570_v28, 5 }
  0x81   : > { %1115 = vrot.lane.b32.xlu1 %v2145_v15, %s2350_s28 }
  0x82   : > { %v534_v51 = vrot.slane %v533_v42, 4  ;;  %v584_v42 = vshll.u32 %v2739_v33, 16  ;;  %v818_v12 = vsel %vm2433_vm4, %v2098_v21, %v817_v11 }
  0x84   : > { %1148 = vrot.lane.b32.xlu0 %v2631_v49, %s2348_s26 }
  0x85   : > { %1150 = vrot.lane.b32.xlu1 %v2665_v29, %s2348_s26 }
  0x87   : > { %v2687_v55 = vpop.permute.xlu1 %1138 }
  0x88   : > { %1183 = vrot.lane.b32.xlu0 %v2129_v58, %s2352_s9  ;;  %v2685_v50 = vpop.permute.xlu0 %1136  ;;  %v539_v58 = vsel %vm2468_vm5, %v534_v51, %v538_v36  ;;  %v575_v36 = vshrl.u32 %v2736_v32, 16 }
  0x89   : > { %1185 = vrot.lane.b32.xlu1 %v2130_v39, %s2352_s9  ;;  %v2714_v8 = vcombine.low %v539_v58, %v549_v59  ;;  %v580_v58 = vrot.slane %v578_v37, 5  ;;  %v586_v59 = vrot.slane %v584_v42, 5  ;;  %v827_v37 = vrot.slane %v288_v2, 5 }
  0x8a   : > { %v577_v53 = vrot.slane %v575_v36, 4  ;;  %v2099_v36 = vrot.slane %v2736_v32, 9 }
  0x8c   : > { %1218 = vrot.lane.b32.xlu0 %v2145_v15, %s2349_s27  ;;  %v560_v15 = vshll.u32 %v2705_v61, 16  ;;  %v590_v61 = vrot.slane %v588_v41, 4  ;;  %v2821_v41 = vld [vmem:[%s2411_s25 + $0x90] sm:$0xf] }
  0x8d   : > { %1220 = vrot.lane.b32.xlu1 %v2683_v48, %s2349_s27  ;;  %v602_v21 = vshll.u32 %v2821_v41, 16 }
  0x8e   : > { %v2709_v62 = vpop.permute.xlu0 %1206  ;;  %v562_v23 = vrot.slane %v560_v15, 5  ;;  %v591_v6 = vor.u32 %v590_v61, %v586_v59 }
  0x90   : > { %1253 = vrot.lane.b32.xlu0 %v2665_v29, %s2353_s10  ;;  %v567_v31 = vor.u32 %v566_v24, %v562_v23  ;;  %v563_v54 = vsel %vm2468_vm5, %v558_v34, %v562_v23  ;;  %v824_v23 = vrot.slane %v2739_v33, 5  ;;  %v592_v28 = vrot.slane %v591_v6, 4  ;;  %v2861_v6 = vld [vmem:[%s2411_s25 + $0xa0] sm:$0xf] }
  0x91   : > { %1255 = vrot.lane.b32.xlu1 %v2694_v56, %s2353_s10  ;;  %v1102_v7 = vpop.permute.xlu1 %1101 }
  0x92   : > { %v568_v40 = vrot.slane %v567_v31, 4 }
  0x94   : > { %1288 = vrot.lane.b32.xlu0 %v2130_v39, %s2354_s11 }
  0x95   : > { %1290 = vrot.lane.b32.xlu1 %v2714_v8, %s2354_s11  ;;  %v1104_v0 = vpop.permute.xlu1 %1103 }
  0x96   : > { %v1022_v20 = vpop.permute.xlu0 %1021 }
  0x97   : > { %v1346_v38 = vsel %vm1343_vm7, %v2106_v46, %v1022_v20  ;;  %v820_v46 = vrot.slane %v285_v22, 5 }
  0x98   : > { %1323 = vrot.lane.b32.xlu0 %v2683_v48, %s2355_s12  ;;  %v1394_v51 = vsel %vm1392_vm8, %v1346_v38, %v1102_v7 }
  0x99   : > { %1037 = vrot.lane.b32.xlu1 %v2130_v39, %s2351_s29  ;;  %v2733_v1 = vpop.permute.xlu1 %1208  ;;  %v1427_v7 = vsel %vm1425_vm9, %v1394_v51, %v2685_v50  ;;  %v825_v51 = vsel %vm2433_vm4, %v2099_v36, %v824_v23 }
  0x9a   : > { %v1024_v30 = vpop.permute.xlu0 %1023 }
  0x9b   : > { %v1349_v47 = vsel %vm1343_vm7, %v2428_v10, %v1024_v30  ;;  %v819_v10 = vrot.slane %v817_v11, 4  ;;  %v596_v30 = vrot.slane %v594_v16, 5 }
  0x9c   : > { %1325 = vrot.lane.b32.xlu0 %v2730_v26, %s2355_s12  ;;  %v1396_v60 = vsel %vm1392_vm8, %v1349_v47, %v1104_v0  ;;  %v581_v0 = vor.u32 %v580_v58, %v577_v53  ;;  %v599_v47 = vshrl.u32 %v2821_v41, 16 }
  0x9d   : > { %1039 = vrot.lane.b32.xlu1 %v2714_v8, %s2351_s29  ;;  %v821_v14 = vsel %vm2433_vm4, %v819_v10, %v820_v46  ;;  %v1429_v50 = vsel %vm1425_vm9, %v1396_v60, %v2687_v55  ;;  %v291_v60 = vld [vmem:[%s2411_s25 + $0x98] sm:$0x1] }
  0x9e   : > { %v1172_v39 = vpop.permute.xlu0 %1171  ;;  %v2795_v55 = vcombine.low %v818_v12, %v821_v14  ;;  %v601_v58 = vrot.slane %v599_v47, 4  ;;  %v618_v12 = vshll.u32 %v291_v60, 16 }
  0x9f   : > { %v1174_v44 = vpop.permute.xlu1 %1173  ;;  %v1460_v9 = vsel %vm1458_vm10, %v1427_v7, %v1172_v39  ;;  %v597_v39 = vsel %vm2468_vm5, %v592_v28, %v596_v30  ;;  %v2100_v30 = vrot.slane %v2821_v41, 9 }
  0xa0   : > { %1117 = vrot.lane.b32.xlu0 %v2683_v48, %s2350_s28  ;;  %v573_v48 = vsel %vm2468_vm5, %v568_v40, %v572_v35  ;;  %v1493_v19 = vsel %vm1491_vm11, %v1460_v9, %v2709_v62  ;;  %v1462_v20 = vsel %vm1458_vm10, %v1429_v50, %v1174_v44  ;;  %v582_v62 = vrot.slane %v581_v0, 4  ;;  %v2827_v44 = vld [vmem:[%s2411_s25 + $0x94] sm:$0xf] }
  0xa1   : > { %1119 = vrot.lane.b32.xlu1 %v2730_v26, %s2350_s28  ;;  %v2779_v5 = vcombine.low %v563_v54, %v573_v48  ;;  %v1495_v11 = vsel %vm1491_vm11, %v1462_v20, %v2733_v1  ;;  %v2812_v35 = vcombine.low %v2736_v32, %v2739_v33  ;;  %v826_v40 = vrot.slane %v824_v23, 4 }
  0xa2   : > { %v1242_v57 = vpop.permute.xlu0 %1241  ;;  %v612_v10 = vshrl.u32 %v2827_v44, 16  ;;  %v608_v53 = vshll.u32 %v2827_v44, 16 }
  0xa3   : > { %v1244_v63 = vpop.permute.xlu1 %1243  ;;  %v1526_v22 = vsel %vm1524_vm12, %v1493_v19, %v1242_v57  ;;  %v828_v54 = vsel %vm2433_vm4, %v826_v40, %v827_v37  ;;  %v831_v19 = vrot.slane %v2827_v44, 5 }
  0xa4   : > { %1152 = vrot.lane.b32.xlu0 %v2694_v56, %s2348_s26  ;;  %v1528_v34 = vsel %vm1524_vm12, %v1495_v11, %v1244_v63  ;;  %v2850_v48 = vcombine.low %v825_v51, %v828_v54  ;;  %v610_v63 = vrot.slane %v608_v53, 5  ;;  %v614_v2 = vrot.slane %v612_v10, 4 }
  0xa5   : > { %1154 = vrot.lane.b32.xlu1 %v2760_v18, %s2348_s26  ;;  %v833_v11 = vrot.slane %v831_v19, 4 }
  0xa6   : > { %v1277_v15 = vpop.permute.xlu0 %1276  ;;  %v615_v50 = vor.u32 %v614_v2, %v610_v63 }
  0xa7   : > { %v1279_v17 = vpop.permute.xlu1 %1278  ;;  %v1559_v24 = vsel %vm1557_vm13, %v1526_v22, %v1277_v15  ;;  %v2858_v15 = vld [vmem:[%s2411_s25 + $0x9c] sm:$0xf] }
  0xa8   : > { %1187 = vrot.lane.b32.xlu0 %v2714_v8, %s2352_s9  ;;  %v1561_v1 = vsel %vm1557_vm13, %v1528_v34, %v1279_v17  ;;  %v620_v17 = vrot.slane %v618_v12, 5  ;;  %v623_v20 = vshrl.u32 %v2858_v15, 16  ;;  %v616_v23 = vrot.slane %v615_v50, 4 }
  0xa9   : > { %1189 = vrot.lane.b32.xlu1 %v2779_v5, %s2352_s9  ;;  %v834_v34 = vrot.slane %v291_v60, 5 }
  0xaa   : > { %v1312_v27 = vpop.permute.xlu0 %1311  ;;  %v625_v36 = vrot.slane %v623_v20, 4 }
  0xab   : > { %v2799_v8 = vpop.permute.xlu1 %1025  ;;  %v1592_v31 = vsel %vm1590_vm14, %v1559_v24, %v1312_v27  ;;  %v626_v24 = vshll.u32 %v2858_v15, 16  ;;  %v636_v27 = vshrl.u32 %v2861_v6, 16 }
  0xac   : > { %1222 = vrot.lane.b32.xlu0 %v2730_v26, %s2349_s27  ;;  %2227 = vmatprep.mubr.msk.bf16.mxu0 %vm1650_vm15, %v1592_v31  ;;  %v587_v26 = vsel %vm2468_vm5, %v582_v62, %v586_v59  ;;  %v604_v59 = vrot.slane %v602_v21, 5  ;;  %v632_v62 = vshll.u32 %v2861_v6, 16  ;;  %v835_v21 = vsel %vm2433_vm4, %v833_v11, %v834_v34 }
  0xad   : > { %1224 = vrot.lane.b32.xlu1 %v2795_v55, %s2349_s27  ;;  %v2834_v32 = vcombine.low %v587_v26, %v597_v39  ;;  %v638_v39 = vrot.slane %v636_v27, 4 }
  0xae   : > { %v1314_v38 = vpop.permute.xlu0 %1313  ;;  %v605_v9 = vor.u32 %v604_v59, %v601_v58  ;;  %v634_v26 = vrot.slane %v632_v62, 5  ;;  %v2944_v62 = vld [vmem:[%s2411_s25 + $0xa8] sm:$0xf] }
  0xaf   : > { %v2823_v42 = vpop.permute.xlu1 %1027  ;;  %v1594_v33 = vsel %vm1590_vm14, %v1561_v1, %v1314_v38  ;;  %v621_v1 = vsel %vm2468_vm5, %v616_v23, %v620_v17  ;;  %v628_v38 = vrot.slane %v626_v24, 5  ;;  %v650_v11 = vshll.u32 %v2944_v62, 16 }
  0xb0   : > { %1257 = vrot.lane.b32.xlu0 %v2760_v18, %s2353_s10  ;;  %2228 = vmatmul.mubr.msk.bf16.vlgmr.msra.gmra.mrb[0].mxu0 %vm1650_vm15, %v1594_v33  ;;  %v606_v16 = vrot.slane %v605_v9, 4  ;;  %v832_v33 = vsel %vm2433_vm4, %v2100_v30, %v831_v19  ;;  %v639_v10 = vor.u32 %v638_v39, %v634_v26  ;;  %v838_v9 = vrot.slane %v2861_v6, 5  ;;  %v2950_v30 = vld [vmem:[%s2411_s25 + $0xac] sm:$0xf] }
  0xb1   : > { %1259 = vrot.lane.b32.xlu1 %v2812_v35, %s2353_s10  ;;  %v629_v54 = vor.u32 %v628_v38, %v625_v36  ;;  %v2911_v60 = vcombine.low %v832_v33, %v835_v21  ;;  %v2101_v19 = vrot.slane %v2858_v15, 9  ;;  %v297_v33 = vld [vmem:[%s2411_s25 + $0xb0] sm:$0x1] }
  0xb2   : > { %v1106_v46 = vpop.permute.xlu0 %1105  ;;  %v611_v31 = vsel %vm2468_vm5, %v606_v16, %v610_v63  ;;  %v840_v27 = vrot.slane %v838_v9, 4 }
  0xb3   : > { %v2844_v57 = vpop.permute.xlu1 %1107  ;;  %v2898_v47 = vcombine.low %v611_v31, %v621_v1  ;;  %v647_v31 = vshrl.u32 %v2944_v62, 16  ;;  %v839_v36 = vsel %vm2433_vm4, %v2101_v19, %v838_v9  ;;  %v660_v1 = vshrl.u32 %v2950_v30, 16 }
  0xb4   : > { %1292 = vrot.lane.b32.xlu0 %v2779_v5, %s2354_s11 }
  0xb5   : > { %1294 = vrot.lane.b32.xlu1 %v2834_v32, %s2354_s11  ;;  %v649_v39 = vrot.slane %v647_v31, 4  ;;  %v662_v21 = vrot.slane %v660_v1, 4 }
  0xb6   : > { %v1141_v61 = vpop.permute.xlu0 %1140 }
  0xb7   : > { %v1143_v7 = vpop.permute.xlu1 %1142 }
  0xb8   : > { %1327 = vrot.lane.b32.xlu0 %v2795_v55, %s2355_s12 }
  0xb9   : > { %1329 = vrot.lane.b32.xlu1 %v2850_v48, %s2355_s12 }
  0xba   : > { %v1176_v14 = vpop.permute.xlu0 %1175 }
  0xbb   : > { %v1178_v0 = vpop.permute.xlu1 %1177 }
  0xbc   : > { %1041 = vrot.lane.b32.xlu0 %v2779_v5, %s2351_s29  ;;  %v2876_v5 = vcombine.low %v2821_v41, %v2827_v44  ;;  %v1352_v41 = vsel %vm1343_vm7, %v2423_v4, %v2799_v8 }
  0xbd   : > { %1043 = vrot.lane.b32.xlu1 %v2834_v32, %s2351_s29  ;;  %v1398_v44 = vsel %vm1392_vm8, %v1352_v41, %v1106_v46  ;;  %v1355_v46 = vsel %vm1343_vm7, %v2524_v45, %v2823_v42 }
  0xbe   : > { %v1211_v22 = vpop.permute.xlu0 %1210  ;;  %v1431_v4 = vsel %vm1425_vm9, %v1398_v44, %v1141_v61  ;;  %v1400_v61 = vsel %vm1392_vm8, %v1355_v46, %v2844_v57  ;;  %v2984_v46 = vld [vmem:[%s2411_s25 + $0xb8] sm:$0xf] }
  0xbf   : > { %v1213_v28 = vpop.permute.xlu1 %1212  ;;  %v1464_v53 = vsel %vm1458_vm10, %v1431_v4, %v1176_v14  ;;  %v1433_v45 = vsel %vm1425_vm9, %v1400_v61, %v1143_v7  ;;  %v630_v14 = vrot.slane %v629_v54, 4 }
  0xc0   : > { %1121 = vrot.lane.b32.xlu0 %v2795_v55, %s2350_s28  ;;  %v2886_v55 = vld [vmem:[%s2411_s25 + $0xa4] sm:$0x1]  ;;  %v1497_v59 = vsel %vm1491_vm11, %v1464_v53, %v1211_v22  ;;  %v1466_v50 = vsel %vm1458_vm10, %v1433_v45, %v1178_v0  ;;  %v2934_v0 = vcombine.low %v2858_v15, %v2861_v6  ;;  %v2981_v53 = vld [vmem:[%s2411_s25 + $0xb4] sm:$0xf] }
  0xc1   : > { %1123 = vrot.lane.b32.xlu1 %v2850_v48, %s2350_s28  ;;  %v642_v51 = vshll.u32 %v2886_v55, 16  ;;  %v1499_v17 = vsel %vm1491_vm11, %v1466_v50, %v1213_v28  ;;  %v841_v20 = vrot.slane %v2886_v55, 5  ;;  %v656_v55 = vshll.u32 %v2950_v30, 16 }
  0xc2   : > { %v1246_v37 = vpop.permute.xlu0 %1245  ;;  %v2102_v50 = vrot.slane %v2944_v62, 9 }
  0xc3   : > { %v1248_v40 = vpop.permute.xlu1 %1247  ;;  %v1530_v63 = vsel %vm1524_vm12, %v1497_v59, %v1246_v37  ;;  %v644_v2 = vrot.slane %v642_v51, 5  ;;  %v842_v37 = vsel %vm2433_vm4, %v840_v27, %v841_v20  ;;  %v658_v44 = vrot.slane %v656_v55, 5 }
  0xc4   : > { %1156 = vrot.lane.b32.xlu0 %v2812_v35, %s2348_s26  ;;  %v1532_v7 = vsel %vm1524_vm12, %v1499_v17, %v1248_v40  ;;  %v652_v40 = vrot.slane %v650_v11, 5 }
  0xc5   : > { %1158 = vrot.lane.b32.xlu1 %v2876_v5, %s2348_s26 }
  0xc6   : > { %v1281_v8 = vpop.permute.xlu0 %1280  ;;  %v653_v4 = vor.u32 %v652_v40, %v649_v39 }
  0xc7   : > { %v1283_v58 = vpop.permute.xlu1 %1282  ;;  %v1563_v42 = vsel %vm1557_vm13, %v1530_v63, %v1281_v8  ;;  %v666_v8 = vshll.u32 %v297_v33, 16  ;;  %v845_v63 = vrot.slane %v2950_v30, 5 }
  0xc8   : > { %1191 = vrot.lane.b32.xlu0 %v2834_v32, %s2352_s9  ;;  %v640_v32 = vrot.slane %v639_v10, 4  ;;  %v1565_v22 = vsel %vm1557_vm13, %v1532_v7, %v1283_v58  ;;  %v663_v10 = vor.u32 %v662_v21, %v658_v44  ;;  %v654_v59 = vrot.slane %v653_v4, 4 }
  0xc9   : > { %1193 = vrot.lane.b32.xlu1 %v2898_v47, %s2352_s9  ;;  %v668_v61 = vrot.slane %v666_v8, 5  ;;  %v847_v17 = vrot.slane %v845_v63, 4  ;;  %v848_v7 = vrot.slane %v297_v33, 5  ;;  %v852_v4 = vrot.slane %v2984_v46, 5 }
  0xca   : > { %v1316_v12 = vpop.permute.xlu0 %1315  ;;  %v645_v24 = vsel %vm2468_vm5, %v640_v32, %v644_v2  ;;  %v671_v2 = vshrl.u32 %v2981_v53, 16  ;;  %v664_v45 = vrot.slane %v663_v10, 4 }
  0xcb   : > { %v2922_v16 = vpop.permute.xlu1 %1029  ;;  %v1596_v57 = vsel %vm1590_vm14, %v1563_v42, %v1316_v12  ;;  %v674_v42 = vshll.u32 %v2981_v53, 16  ;;  %v684_v12 = vshrl.u32 %v2984_v46, 16  ;;  %v849_v11 = vsel %vm2433_vm4, %v847_v17, %v848_v7 }
  0xcc   : > { %1226 = vrot.lane.b32.xlu0 %v2850_v48, %s2349_s27  ;;  %2231 = vmatprep.mubr.msk.bf16.mxu0 %vm1650_vm15, %v1596_v57  ;;  %v635_v48 = vsel %vm2468_vm5, %v630_v14, %v634_v26  ;;  %v2973_v26 = vcombine.low %v839_v36, %v842_v37  ;;  %v680_v14 = vshll.u32 %v2984_v46, 16  ;;  %v659_v57 = vsel %vm2468_vm5, %v654_v59, %v658_v44 }
  0xcd   : > { %1228 = vrot.lane.b32.xlu1 %v2911_v60, %s2349_s27  ;;  %v2957_v15 = vcombine.low %v635_v48, %v645_v24  ;;  %v673_v19 = vrot.slane %v671_v2, 4  ;;  %v686_v24 = vrot.slane %v684_v12, 4  ;;  %v2103_v2 = vrot.slane %v2981_v53, 9 }
  0xce   : > { %v1318_v23 = vpop.permute.xlu0 %1317  ;;  %v682_v48 = vrot.slane %v680_v14, 5 }
  0xcf   : > { %v2946_v28 = vpop.permute.xlu1 %1031  ;;  %v1598_v6 = vsel %vm1590_vm14, %v1565_v22, %v1318_v23  ;;  %v669_v22 = vsel %vm2468_vm5, %v664_v45, %v668_v61  ;;  %v676_v23 = vrot.slane %v674_v42, 5  ;;  %v3065_v45 = vld [vmem:[%s2411_s25 + $0xc4] sm:$0xf] }
  0xd0   : > { %1261 = vrot.lane.b32.xlu0 %v2876_v5, %s2353_s10  ;;  %2232 = vmatmul.mubr.msk.bf16.gmra.mrb[4].mxu0 %vm1650_vm15, %v1598_v6  ;;  %v846_v6 = vsel %vm2433_vm4, %v2102_v50, %v845_v63  ;;  %v3021_v31 = vcombine.low %v659_v57, %v669_v22  ;;  %v687_v1 = vor.u32 %v686_v24, %v682_v48  ;;  %v871_v17 = vshrl.u32 %v3065_v45, 16 }
  0xd1   : > { %1263 = vrot.lane.b32.xlu1 %v2934_v0, %s2353_s10  ;;  %v677_v37 = vor.u32 %v676_v23, %v673_v19  ;;  %v3034_v33 = vcombine.low %v846_v6, %v849_v11  ;;  %v867_v7 = vshll.u32 %v3065_v45, 16  ;;  %v853_v22 = vsel %vm2433_vm4, %v2103_v2, %v852_v4 }
  0xd2   : > { %v1110_v34 = vpop.permute.xlu0 %1109 }
  0xd3   : > { %v2967_v38 = vpop.permute.xlu1 %1111  ;;  %v678_v8 = vrot.slane %v677_v37, 4 }
  0xd4   : > { %1296 = vrot.lane.b32.xlu0 %v2898_v47, %s2354_s11 }
  0xd5   : > { %1298 = vrot.lane.b32.xlu1 %v2957_v15, %s2354_s11  ;;  %v683_v12 = vsel %vm2468_vm5, %v678_v8, %v682_v48 }
  0xd6   : > { %v1145_v41 = vpop.permute.xlu0 %1144 }
  0xd7   : > { %v1147_v51 = vpop.permute.xlu1 %1146 }
  0xd8   : > { %1331 = vrot.lane.b32.xlu0 %v2911_v60, %s2355_s12 }
  0xd9   : > { %1333 = vrot.lane.b32.xlu1 %v2973_v26, %s2355_s12 }
  0xda   : > { %v1180_v54 = vpop.permute.xlu0 %1179 }
  0xdb   : > { %v1182_v58 = vpop.permute.xlu1 %1181 }
  0xdc   : > { %1045 = vrot.lane.b32.xlu0 %v2898_v47, %s2351_s29  ;;  %v2999_v47 = vcombine.low %v2944_v62, %v2950_v30  ;;  %v1358_v62 = vsel %vm1343_vm7, %v2558_v25, %v2922_v16 }
  0xdd   : > { %1047 = vrot.lane.b32.xlu1 %v2957_v15, %s2351_s29  ;;  %v1402_v30 = vsel %vm1392_vm8, %v1358_v62, %v1110_v34  ;;  %v1361_v34 = vsel %vm1343_vm7, %v2579_v43, %v2946_v28  ;;  %v873_v62 = vrot.slane %v871_v17, 4 }
  0xde   : > { %v1215_v9 = vpop.permute.xlu0 %1214  ;;  %v1435_v25 = vsel %vm1425_vm9, %v1402_v30, %v1145_v41  ;;  %v1404_v41 = vsel %vm1392_vm8, %v1361_v34, %v2967_v38  ;;  %v303_v30 = vld [vmem:[%s2411_s25 + $0xc8] sm:$0x1] }
  0xdf   : > { %v1217_v32 = vpop.permute.xlu1 %1216  ;;  %v1468_v55 = vsel %vm1458_vm10, %v1435_v25, %v1180_v54  ;;  %v1437_v43 = vsel %vm1425_vm9, %v1404_v41, %v1147_v51  ;;  %v688_v54 = vrot.slane %v687_v1, 4  ;;  %v3053_v51 = vld [vmem:[%s2411_s25 + $0xc0] sm:$0xf]  ;;  %v877_v37 = vshll.u32 %v303_v30, 16  ;;  %v3104_v1 = vld [vmem:[%s2411_s25 + $0xcc] sm:$0xf] }
  0xe0   : > { %1125 = vrot.lane.b32.xlu0 %v2911_v60, %s2350_s28  ;;  %v3009_v60 = vld [vmem:[%s2411_s25 + $0xbc] sm:$0x1]  ;;  %v1501_v40 = vsel %vm1491_vm11, %v1468_v55, %v1215_v9  ;;  %v1470_v10 = vsel %vm1458_vm10, %v1437_v43, %v1182_v58  ;;  %v3060_v58 = vcombine.low %v2981_v53, %v2984_v46  ;;  %v858_v53 = vshrl.u32 %v3053_v51, 16 }
  0xe1   : > { %1127 = vrot.lane.b32.xlu1 %v2973_v26, %s2350_s28  ;;  %v690_v36 = vshll.u32 %v3009_v60, 16  ;;  %v1503_v61 = vsel %vm1491_vm11, %v1470_v10, %v1217_v32  ;;  %v855_v9 = vrot.slane %v3009_v60, 5  ;;  %v854_v32 = vrot.slane %v852_v4, 4 }
  0xe2   : > { %v1250_v20 = vpop.permute.xlu0 %1249  ;;  %v861_v57 = vshll.u32 %v3053_v51, 16  ;;  %v860_v48 = vrot.slane %v858_v53, 4  ;;  %v895_v4 = vshll.u32 %v3104_v1, 16  ;;  %v886_v43 = vrot.slane %v3065_v45, 5 }
  0xe3   : > { %v1252_v27 = vpop.permute.xlu1 %1251  ;;  %v1534_v44 = vsel %vm1524_vm12, %v1501_v40, %v1250_v20  ;;  %v692_v21 = vrot.slane %v690_v36, 5  ;;  %v856_v60 = vsel %vm2433_vm4, %v854_v32, %v855_v9 }
  0xe4   : > { %1160 = vrot.lane.b32.xlu0 %v2934_v0, %s2348_s26  ;;  %v1536_v63 = vsel %vm1524_vm12, %v1503_v61, %v1252_v27  ;;  %v863_v24 = vrot.slane %v861_v57, 5  ;;  %v869_v27 = vrot.slane %v867_v7, 5  ;;  %v3096_v6 = vcombine.low %v853_v22, %v856_v60 }
  0xe5   : > { %1162 = vrot.lane.b32.xlu1 %v2999_v47, %s2348_s26  ;;  %v693_v14 = vsel %vm2468_vm5, %v688_v54, %v692_v21  ;;  %v892_v21 = vshrl.u32 %v3104_v1, 16  ;;  %v2104_v61 = vrot.slane %v3053_v51, 9  ;;  %v897_v2 = vrot.slane %v895_v4, 5 }
  0xe6   : > { %v1285_v16 = vpop.permute.xlu0 %1284  ;;  %v3084_v19 = vcombine.low %v683_v12, %v693_v14  ;;  %v864_v25 = vor.u32 %v863_v24, %v860_v48  ;;  %v888_v9 = vrot.slane %v886_v43, 4  ;;  %v306_v14 = vld [vmem:[%s2411_s25 + $0xd4] sm:$0x1] }
  0xe7   : > { %v1287_v39 = vpop.permute.xlu1 %1286  ;;  %v1567_v28 = vsel %vm1557_vm13, %v1534_v44, %v1285_v16  ;;  %v874_v16 = vor.u32 %v873_v62, %v869_v27  ;;  %v879_v44 = vrot.slane %v877_v37, 5  ;;  %v911_v22 = vshll.u32 %v306_v14, 16 }
  0xe8   : > { %1195 = vrot.lane.b32.xlu0 %v2957_v15, %s2352_s9  ;;  %v865_v40 = vrot.slane %v864_v25, 4 }
  0xe9   : > { %1197 = vrot.lane.b32.xlu1 %v3021_v31, %s2352_s9  ;;  %v875_v41 = vrot.slane %v874_v16, 4  ;;  %v913_v16 = vrot.slane %v911_v22, 5 }
  0xea   : > { %v1320_v15 = vpop.permute.xlu0 %1319  ;;  %v870_v10 = vsel %vm2468_vm5, %v865_v40, %v869_v27 }
  0xeb   : > { %v3045_v38 = vpop.permute.xlu1 %1033  ;;  %v1600_v59 = vsel %vm1590_vm14, %v1567_v28, %v1320_v15 }
  0xec   : > { %1230 = vrot.lane.b32.xlu0 %v2973_v26, %s2349_s27  ;;  %2235 = vmatprep.mubr.msk.bf16.mxu0 %vm1650_vm15, %v1600_v59  ;;  %v1569_v26 = vsel %vm1557_vm13, %v1536_v63, %v1287_v39  ;;  %v3107_v39 = vld [vmem:[%s2411_s25 + $0xd0] sm:$0xf]  ;;  %v880_v59 = vsel %vm2468_vm5, %v875_v41, %v879_v44  ;;  %v894_v63 = vrot.slane %v892_v21, 4  ;;  %s2183_s25 = sshll.u32 %s3381_s18, 4 }
  0xed   : > { %1232 = vrot.lane.b32.xlu1 %v3034_v33, %s2349_s27  ;;  %v905_v28 = vshrl.u32 %v3107_v39, 16  ;;  %v901_v15 = vshll.u32 %v3107_v39, 16 }
  0xee   : > { %v1322_v42 = vpop.permute.xlu0 %1321  ;;  %v898_v53 = vor.u32 %v897_v2, %v894_v63 }
  0xef   : > { %v3072_v50 = vpop.permute.xlu1 %1035  ;;  %v1602_v46 = vsel %vm1590_vm14, %v1569_v26, %v1322_v42  ;;  %v889_v26 = vrot.slane %v303_v30, 5  ;;  %v903_v42 = vrot.slane %v901_v15, 5  ;;  %v923_v15 = vrot.slane %v306_v14, 5 }
  0xf0   : > { %1265 = vrot.lane.b32.xlu0 %v2999_v47, %s2353_s10  ;;  %2236 = vmatmul.mubr.msk.bf16.gmra.mrb[8].mxu0 %vm1650_vm15, %v1602_v46  ;;  %v887_v46 = vsel %vm2433_vm4, %v2104_v61, %v886_v43  ;;  %v1367_v24 = vsel %vm1343_vm7, %v2631_v49, %v3072_v50  ;;  %v899_v62 = vrot.slane %v898_v53, 4 }
  0xf1   : > { %1267 = vrot.lane.b32.xlu1 %v3060_v58, %s2353_s10  ;;  %v890_v17 = vsel %vm2433_vm4, %v888_v9, %v889_v26 }
  0xf2   : > { %v1114_v20 = vpop.permute.xlu0 %1113 }
  0xf3   : > { %v3090_v23 = vpop.permute.xlu1 %1115 }
  0xf4   : > { %1300 = vrot.lane.b32.xlu0 %v3021_v31, %s2354_s11  ;;  %v1408_v30 = vsel %vm1392_vm8, %v1367_v24, %v3090_v23 }
  0xf5   : > { %1302 = vrot.lane.b32.xlu1 %v3084_v19, %s2354_s11 }
  0xf6   : > { %v1149_v11 = vpop.permute.xlu0 %1148 }
  0xf7   : > { %v1151_v36 = vpop.permute.xlu1 %1150 }
  0xf8   : > { %1335 = vrot.lane.b32.xlu0 %v3034_v33, %s2355_s12  ;;  %v1441_v37 = vsel %vm1425_vm9, %v1408_v30, %v1151_v36  ;;  %v2157_v36 = vcombine.low %v3104_v1, %v3107_v39 }
  0xf9   : > { %1337 = vrot.lane.b32.xlu1 %v3096_v6, %s2355_s12 }
  0xfa   : > { %v1184_v55 = vpop.permute.xlu0 %1183 }
  0xfb   : > { %v1186_v34 = vpop.permute.xlu1 %1185 }
  0xfc   : > { %1049 = vrot.lane.b32.xlu0 %v3021_v31, %s2351_s29  ;;  %v2154_v31 = vcombine.low %v3053_v51, %v3065_v45  ;;  %v907_v45 = vrot.slane %v905_v28, 4  ;;  %v2155_v51 = vcombine.low %v870_v10, %v880_v59 }
  0xfd   : > { %1051 = vrot.lane.b32.xlu1 %v3084_v19, %s2351_s29 }
  0xfe   : > { %v1219_v8 = vpop.permute.xlu0 %1218  ;;  %v908_v7 = vor.u32 %v907_v45, %v903_v42 }
  0xff   : > { %v1221_v54 = vpop.permute.xlu1 %1220 }
 0x100   : > { %1129 = vrot.lane.b32.xlu0 %v3034_v33, %s2350_s28  ;;  %v1364_v33 = vsel %vm1343_vm7, %v2611_v3, %v3045_v38  ;;  %v909_v25 = vrot.slane %v908_v7, 4 }
 0x101   : > { %1131 = vrot.lane.b32.xlu1 %v3096_v6, %s2350_s28  ;;  %v1406_v57 = vsel %vm1392_vm8, %v1364_v33, %v1114_v20  ;;  %v2156_v20 = vcombine.low %v887_v46, %v890_v17  ;;  %s246_s28 = scalar_lea.vmem %s3371_s5, %s2183_s25 }
 0x102   : > { %v1254_v12 = vpop.permute.xlu0 %1253  ;;  %v1439_v60 = vsel %vm1425_vm9, %v1406_v57, %v1149_v11  ;;  %v914_v21 = vsel %vm2468_vm5, %v909_v25, %v913_v16 }
 0x103   : > { %v1256_v32 = vpop.permute.xlu1 %1255  ;;  %v1472_v38 = vsel %vm1458_vm10, %v1439_v60, %v1184_v55  ;;  %v920_v55 = vrot.slane %v3107_v39, 5 }
 0x104   : > { %1164 = vrot.lane.b32.xlu0 %v3060_v58, %s2348_s26  ;;  %v1505_v27 = vsel %vm1491_vm11, %v1472_v38, %v1219_v8 }
 0x105   : > { %1166 = vrot.lane.b32.xlu1 %v2154_v31, %s2348_s26  ;;  %v1538_v11 = vsel %vm1524_vm12, %v1505_v27, %v1254_v12  ;;  %v922_v28 = vrot.slane %v920_v55, 4 }
 0x106   : > { %v1289_v3 = vpop.permute.xlu0 %1288 }
 0x107   : > { %v1291_v48 = vpop.permute.xlu1 %1290  ;;  %v1571_v49 = vsel %vm1557_vm13, %v1538_v11, %v1289_v3  ;;  %v924_v59 = vsel %vm2433_vm4, %v922_v28, %v923_v15 }
 0x108   : > { %1199 = vrot.lane.b32.xlu0 %v3084_v19, %s2352_s9  ;;  %v1474_v19 = vsel %vm1458_vm10, %v1441_v37, %v1186_v34  ;;  %v904_v34 = vsel %vm2468_vm5, %v899_v62, %v903_v42 }
 0x109   : > { %1201 = vrot.lane.b32.xlu1 %v2155_v51, %s2352_s9  ;;  %v1507_v23 = vsel %vm1491_vm11, %v1474_v19, %v1221_v54  ;;  %v2158_v39 = vcombine.low %v904_v34, %v914_v21 }
 0x10a   : > { %v1324_v50 = vpop.permute.xlu0 %1323  ;;  %v1540_v44 = vsel %vm1524_vm12, %v1507_v23, %v1256_v32 }
 0x10b   : > { %v1038_v40 = vpop.permute.xlu1 %1037  ;;  %v1604_v41 = vsel %vm1590_vm14, %v1571_v49, %v1324_v50  ;;  %v1573_v4 = vsel %vm1557_vm13, %v1540_v44, %v1291_v48 }
 0x10c   : > { %1234 = vrot.lane.b32.xlu0 %v3096_v6, %s2349_s27  ;;  %2239 = vmatprep.mubr.msk.bf16.mxu0 %vm1650_vm15, %v1604_v41  ;;  %v2105_v6 = vrot.slane %v3104_v1, 9  ;;  %v1370_v13 = vsel %vm1343_vm7, %v2665_v29, %v1038_v40 }
 0x10d   : > { %1236 = vrot.lane.b32.xlu1 %v2156_v20, %s2349_s27 }
 0x10e   : > { %v1326_v43 = vpop.permute.xlu0 %1325  ;;  %v921_v52 = vsel %vm2433_vm4, %v2105_v6, %v920_v55 }
 0x10f   : > { %v1040_v8 = vpop.permute.xlu1 %1039  ;;  %v1606_v54 = vsel %vm1590_vm14, %v1573_v4, %v1326_v43  ;;  %v2159_v61 = vcombine.low %v921_v52, %v924_v59 }
 0x110   : > { %1269 = vrot.lane.b32.xlu0 %v2154_v31, %s2353_s10  ;;  %2240 = vmatmul.mubr.msk.bf16.gmra.mrb[12].mxu0 %vm1650_vm15, %v1606_v54  ;;  %v1373_v14 = vsel %vm1343_vm7, %v2694_v56, %v1040_v8 }
 0x111   : > { %1271 = vrot.lane.b32.xlu1 %v2157_v36, %s2353_s10 }
 0x112   : > { %v1118_v10 = vpop.permute.xlu0 %1117 }
 0x113   : > { %v1120_v1 = vpop.permute.xlu1 %1119  ;;  %v1410_v32 = vsel %vm1392_vm8, %v1370_v13, %v1118_v10 }
 0x114   : > { %1304 = vrot.lane.b32.xlu0 %v2155_v51, %s2354_s11  ;;  %v1412_v33 = vsel %vm1392_vm8, %v1373_v14, %v1120_v1 }
 0x115   : > { %1306 = vrot.lane.b32.xlu1 %v2158_v39, %s2354_s11 }
 0x116   : > { %v1153_v63 = vpop.permute.xlu0 %1152 }
 0x117   : > { %v1155_v31 = vpop.permute.xlu1 %1154  ;;  %v1443_v51 = vsel %vm1425_vm9, %v1410_v32, %v1153_v63 }
 0x118   : > { %1339 = vrot.lane.b32.xlu0 %v2156_v20, %s2355_s12  ;;  %v1445_v53 = vsel %vm1425_vm9, %v1412_v33, %v1155_v31 }
 0x119   : > { %1341 = vrot.lane.b32.xlu1 %v2159_v61, %s2355_s12 }
 0x11a   : > { %v1188_v2 = vpop.permute.xlu0 %1187 }
 0x11b   : > { %v1190_v9 = vpop.permute.xlu1 %1189  ;;  %v1476_v57 = vsel %vm1458_vm10, %v1443_v51, %v1188_v2 }
 0x11c   : > { %v1478_v7 = vsel %vm1458_vm10, %v1445_v53, %v1190_v9 }
 0x11e   : > { %v1223_v26 = vpop.permute.xlu0 %1222 }
 0x11f   : > { %v1225_v42 = vpop.permute.xlu1 %1224  ;;  %v1509_v22 = vsel %vm1491_vm11, %v1476_v57, %v1223_v26 }
 0x120   : > { %v1511_v29 = vsel %vm1491_vm11, %v1478_v7, %v1225_v42 }
 0x122   : > { %v1258_v45 = vpop.permute.xlu0 %1257 }
 0x123   : > { %v1260_v12 = vpop.permute.xlu1 %1259  ;;  %v1542_v56 = vsel %vm1524_vm12, %v1509_v22, %v1258_v45 }
 0x124   : > { %v1544_v60 = vsel %vm1524_vm12, %v1511_v29, %v1260_v12 }
 0x126   : > { %v1293_v46 = vpop.permute.xlu0 %1292 }
 0x127   : > { %v1295_v17 = vpop.permute.xlu1 %1294  ;;  %v1575_v3 = vsel %vm1557_vm13, %v1542_v56, %v1293_v46 }
 0x128   : > { %v1577_v48 = vsel %vm1557_vm13, %v1544_v60, %v1295_v17 }
 0x12a   : > { %v1328_v38 = vpop.permute.xlu0 %1327 }
 0x12b   : > { %v1330_v24 = vpop.permute.xlu1 %1329  ;;  %v1608_v27 = vsel %vm1590_vm14, %v1575_v3, %v1328_v38 }
 0x12c   : > { %v1610_v20 = vsel %vm1590_vm14, %v1577_v48, %v1330_v24  ;;  %2243 = vmatprep.mubr.msk.bf16.mxu0 %vm1650_vm15, %v1608_v27 }
 0x12d   : > { %2244 = vmatmul.mubr.msk.bf16.gmra.mrb[16].mxu0 %vm1650_vm15, %v1610_v20 }
 0x12e   : > { %v1042_v62 = vpop.permute.xlu0 %1041 }
 0x12f   : > { %v1044_v30 = vpop.permute.xlu1 %1043  ;;  %v1376_v23 = vsel %vm1343_vm7, %v2760_v18, %v1042_v62 }
 0x130   : > { %v1379_v44 = vsel %vm1343_vm7, %v2812_v35, %v1044_v30 }
 0x132   : > { %v1122_v11 = vpop.permute.xlu0 %1121 }
 0x133   : > { %v1124_v25 = vpop.permute.xlu1 %1123  ;;  %v1414_v36 = vsel %vm1392_vm8, %v1376_v23, %v1122_v11  ;;  %v3247_v23 = vld [vmem:[%s3368_s2] ss:$0 sm:$0xff] }
 0x134   : > { %v1416_v34 = vsel %vm1392_vm8, %v1379_v44, %v1124_v25 }
 0x136   : > { %v1157_v16 = vpop.permute.xlu0 %1156 }
 0x137   : > { %v1159_v37 = vpop.permute.xlu1 %1158  ;;  %v1447_v21 = vsel %vm1425_vm9, %v1414_v36, %v1157_v16 }
 0x138   : > { %v1449_v43 = vsel %vm1425_vm9, %v1416_v34, %v1159_v37 }
 0x13a   : > { %v1192_v49 = vpop.permute.xlu0 %1191 }
 0x13b   : > { %v1194_v50 = vpop.permute.xlu1 %1193  ;;  %v1480_v6 = vsel %vm1458_vm10, %v1447_v21, %v1192_v49 }
 0x13c   : > { %v1482_v15 = vsel %vm1458_vm10, %v1449_v43, %v1194_v50 }
 0x13e   : > { %v1227_v55 = vpop.permute.xlu0 %1226 }
 0x13f   : > { %v1229_v19 = vpop.permute.xlu1 %1228  ;;  %v1513_v8 = vsel %vm1491_vm11, %v1480_v6, %v1227_v55 }
 0x140   : > { %v1515_v18 = vsel %vm1491_vm11, %v1482_v15, %v1229_v19 }
 0x142   : > { %v1262_v40 = vpop.permute.xlu0 %1261 }
 0x143   : > { %v1264_v41 = vpop.permute.xlu1 %1263  ;;  %v1546_v35 = vsel %vm1524_vm12, %v1513_v8, %v1262_v40 }
 0x144   : > { %v1548_v54 = vsel %vm1524_vm12, %v1515_v18, %v1264_v41 }
 0x146   : > { %v1297_v4 = vpop.permute.xlu0 %1296 }
 0x147   : > { %v1299_v28 = vpop.permute.xlu1 %1298  ;;  %v1579_v39 = vsel %vm1557_vm13, %v1546_v35, %v1297_v4 }
 0x148   : > { %v1581_v52 = vsel %vm1557_vm13, %v1548_v54, %v1299_v28 }
 0x14a   : > { %v1332_v10 = vpop.permute.xlu0 %1331 }
 0x14b   : > { %v1334_v59 = vpop.permute.xlu1 %1333  ;;  %v1612_v1 = vsel %vm1590_vm14, %v1579_v39, %v1332_v10 }
 0x14c   : > { %v1614_v61 = vsel %vm1590_vm14, %v1581_v52, %v1334_v59  ;;  %2247 = vmatprep.mubr.msk.bf16.mxu0 %vm1650_vm15, %v1612_v1 }
 0x14d   : > { %2248 = vmatmul.mubr.msk.bf16.gmra.mrb[20].mxu0 %vm1650_vm15, %v1614_v61 }
 0x14e   : > { %v1046_v63 = vpop.permute.xlu0 %1045 }
 0x14f   : > { %v1048_v31 = vpop.permute.xlu1 %1047  ;;  %v1382_v51 = vsel %vm1343_vm7, %v2876_v5, %v1046_v63 }
 0x150   : > { %v1385_v46 = vsel %vm1343_vm7, %v2934_v0, %v1048_v31 }
 0x152   : > { %v1126_v2 = vpop.permute.xlu0 %1125 }
 0x153   : > { %v1128_v9 = vpop.permute.xlu1 %1127  ;;  %v1418_v53 = vsel %vm1392_vm8, %v1382_v51, %v1126_v2 }
 0x154   : > { %v1420_v57 = vsel %vm1392_vm8, %v1385_v46, %v1128_v9 }
 0x156   : > { %v1161_v26 = vpop.permute.xlu0 %1160 }
 0x157   : > { %v1163_v42 = vpop.permute.xlu1 %1162  ;;  %v1451_v17 = vsel %vm1425_vm9, %v1418_v53, %v1161_v26 }
 0x158   : > { %v1453_v22 = vsel %vm1425_vm9, %v1420_v57, %v1163_v42 }
 0x15a   : > { %v1196_v45 = vpop.permute.xlu0 %1195 }
 0x15b   : > { %v1198_v12 = vpop.permute.xlu1 %1197  ;;  %v1484_v29 = vsel %vm1458_vm10, %v1451_v17, %v1196_v45 }
 0x15c   : > { %v1486_v60 = vsel %vm1458_vm10, %v1453_v22, %v1198_v12 }
 0x15e   : > { %v1231_v13 = vpop.permute.xlu0 %1230 }
 0x15f   : > { %v1233_v14 = vpop.permute.xlu1 %1232  ;;  %v1517_v3 = vsel %vm1491_vm11, %v1484_v29, %v1231_v13 }
 0x160   : > { %v1519_v5 = vsel %vm1491_vm11, %v1486_v60, %v1233_v14 }
 0x162   : > { %v1266_v32 = vpop.permute.xlu0 %1265 }
 0x163   : > { %v1268_v33 = vpop.permute.xlu1 %1267  ;;  %v1550_v0 = vsel %vm1524_vm12, %v1517_v3, %v1266_v32 }
 0x164   : > { %v1552_v38 = vsel %vm1524_vm12, %v1519_v5, %v1268_v33 }
 0x166   : > { %v1301_v7 = vpop.permute.xlu0 %1300 }
 0x167   : > { %v1303_v56 = vpop.permute.xlu1 %1302  ;;  %v1583_v48 = vsel %vm1557_vm13, %v1550_v0, %v1301_v7 }
 0x168   : > { %v1585_v27 = vsel %vm1557_vm13, %v1552_v38, %v1303_v56 }
 0x16a   : > { %v1336_v24 = vpop.permute.xlu0 %1335 }
 0x16b   : > { %v1338_v20 = vpop.permute.xlu1 %1337  ;;  %v1616_v62 = vsel %vm1590_vm14, %v1583_v48, %v1336_v24 }
 0x16c   : > { %v1618_v30 = vsel %vm1590_vm14, %v1585_v27, %v1338_v20  ;;  %2251 = vmatprep.mubr.msk.bf16.mxu0 %vm1650_vm15, %v1616_v62 }
 0x16d   : > { %2252 = vmatmul.mubr.msk.bf16.gmra.mrb[24].mxu0 %vm1650_vm15, %v1618_v30 }
 0x16e   : > { %v1050_v11 = vpop.permute.xlu0 %1049 }
 0x16f   : > { %v1052_v25 = vpop.permute.xlu1 %1051  ;;  %v1388_v21 = vsel %vm1343_vm7, %v2999_v47, %v1050_v11 }
 0x170   : > { %v1391_v6 = vsel %vm1343_vm7, %v3060_v58, %v1052_v25 }
 0x172   : > { %v1130_v16 = vpop.permute.xlu0 %1129 }
 0x173   : > { %v1132_v37 = vpop.permute.xlu1 %1131  ;;  %v1422_v28 = vsel %vm1392_vm8, %v1388_v21, %v1130_v16 }
 0x174   : > { %v1424_v18 = vsel %vm1392_vm8, %v1391_v6, %v1132_v37 }
 0x176   : > { %v1165_v49 = vpop.permute.xlu0 %1164 }
 0x177   : > { %v1167_v50 = vpop.permute.xlu1 %1166  ;;  %v1455_v35 = vsel %vm1425_vm9, %v1422_v28, %v1165_v49 }
 0x178   : > { %v1457_v47 = vsel %vm1425_vm9, %v1424_v18, %v1167_v50 }
 0x17a   : > { %v1200_v55 = vpop.permute.xlu0 %1199 }
 0x17b   : > { %v1202_v19 = vpop.permute.xlu1 %1201  ;;  %v1488_v52 = vsel %vm1458_vm10, %v1455_v35, %v1200_v55 }
 0x17c   : > { %v1490_v1 = vsel %vm1458_vm10, %v1457_v47, %v1202_v19  ;;  %v3304_v47 = vld [vmem:[%s3369_s3] sm:$0xf] }
 0x17d   : > { %2219 = vmatprep.mubr.msk.bf16.mxu1 %vm1590_vm14, %v3304_v47 }
 0x17e   : > { %v1235_v40 = vpop.permute.xlu0 %1234 }
 0x17f   : > { %v1237_v41 = vpop.permute.xlu1 %1236  ;;  %v1521_v61 = vsel %vm1491_vm11, %v1488_v52, %v1235_v40  ;;  %v1897_v52 = vld [vmem:[%s3370_s4] sm:$0xff] }
 0x180   : > { %v1523_v2 = vsel %vm1491_vm11, %v1490_v1, %v1237_v41 }
 0x182   : > { %v1270_v44 = vpop.permute.xlu0 %1269 }
 0x183   : > { %v1272_v36 = vpop.permute.xlu1 %1271  ;;  %v2229_v34 = vpop.f32.mrb[0].mxu0  ;;  %v1554_v9 = vsel %vm1524_vm12, %v1521_v61, %v1270_v44 }
 0x184   : > { %v1730_v4 = vadd.f32 %v2229_v34, %v3247_v23  ;;  %v1721_v43 = vpop.f32.mrb[1].mxu0  ;;  %v1556_v45 = vsel %vm1524_vm12, %v1523_v2, %v1272_v36 }
 0x185   : > { %v1722_v15 = vadd.f32 %v3247_v23, %v1721_v43  ;;  %v2230_v8 = vpop.f32.mrb[2].mxu0 }
 0x186   : > { %v1733_v54 = vadd.f32 %v2230_v8, %v3247_v23  ;;  %v1724_v39 = vpop.f32.mrb[3].mxu0  ;;  %v1305_v10 = vpop.permute.xlu0 %1304  ;;  %v1850_v63 = vmax.f32 %v1730_v4, 0.0 }
 0x187   : > { %v1307_v59 = vpop.permute.xlu1 %1306  ;;  %v1725_v58 = vadd.f32 %v3247_v23, %v1724_v39  ;;  %v1848_v26 = vmax.f32 %v1722_v15, 0.0  ;;  %v1587_v13 = vsel %vm1557_vm13, %v1554_v9, %v1305_v10 }
 0x188   : > { %v1851_v31 = vmax.f32 %v1733_v54, 0.0  ;;  %v1589_v32 = vsel %vm1557_vm13, %v1556_v45, %v1307_v59  ;;  %v2356_v59 = vmov 0  }
 0x189   : > { %v1849_v42 = vmax.f32 %v1725_v58, 0.0  ;;  %2302 = vset.pattern.permute.xlu0 %v2356_v59 }
 0x18a   : > { %v3267_v12 = vpack.c.bf16 %v1851_v31, %v1850_v63  ;;  %v1340_v14 = vpop.permute.xlu0 %1339  ;;  %1900 = vperm.xlu0 %2302, %v1897_v52  }
 0x18b   : > { %v1342_v33 = vpop.permute.xlu1 %1341  ;;  %v1620_v51 = vsel %vm1590_vm14, %v1587_v13, %v1340_v14  ;;  %v3272_v46 = vpack.c.bf16 %v1849_v42, %v1848_v26 }
 0x18c   : > { %v1622_v53 = vsel %vm1590_vm14, %v1589_v32, %v1342_v33  ;;  %2255 = vmatprep.mubr.msk.bf16.mxu0 %vm1650_vm15, %v1620_v51 }
 0x18d   : > { %2256 = vmatmul.mubr.msk.bf16.gmra.mrb[28].mxu0 %vm1650_vm15, %v1622_v53  ;;  %v1907_v51 = vsel %vm1590_vm14, %v3272_v46, 0  ;;  %v1910_v53 = vsel %vm1590_vm14, %v3267_v12, 0 }
 0x1a3   : > { %v2233_v57 = vpop.f32.mrb[4].mxu0 }
 0x1a4   : > { %v1746_v17 = vadd.f32 %v2233_v57, %v3247_v23  ;;  %v1737_v7 = vpop.f32.mrb[5].mxu0 }
 0x1a5   : > { %v1738_v22 = vadd.f32 %v3247_v23, %v1737_v7  ;;  %v2234_v29 = vpop.f32.mrb[6].mxu0 }
 0x1a6   : > { %v1749_v56 = vadd.f32 %v2234_v29, %v3247_v23  ;;  %v1740_v60 = vpop.f32.mrb[7].mxu0  ;;  %v1854_v5 = vmax.f32 %v1746_v17, 0.0 }
 0x1a7   : > { %v1741_v3 = vadd.f32 %v3247_v23, %v1740_v60  ;;  %v1852_v38 = vmax.f32 %v1738_v22, 0.0 }
 0x1a8   : > { %v1855_v0 = vmax.f32 %v1749_v56, 0.0 }
 0x1a9   : > { %v1853_v48 = vmax.f32 %v1741_v3, 0.0 }
 0x1aa   : > { %v3281_v24 = vpack.c.bf16 %v1855_v0, %v1854_v5 }
 0x1ab   : > { %v3283_v27 = vpack.c.bf16 %v1853_v48, %v1852_v38 }
 0x1ad   : > { %v1913_v12 = vsel %vm1590_vm14, %v3283_v27, 0 }
 0x1c3   : > { %v2237_v20 = vpop.f32.mrb[8].mxu0 }
 0x1c4   : > { %v1762_v62 = vadd.f32 %v2237_v20, %v3247_v23  ;;  %v1753_v30 = vpop.f32.mrb[9].mxu0 }
 0x1c5   : > { %v1754_v11 = vadd.f32 %v3247_v23, %v1753_v30  ;;  %v2238_v25 = vpop.f32.mrb[10].mxu0 }
 0x1c6   : > { %v1765_v16 = vadd.f32 %v2238_v25, %v3247_v23  ;;  %v1756_v37 = vpop.f32.mrb[11].mxu0  ;;  %v1858_v50 = vmax.f32 %v1762_v62, 0.0  ;;  %v1916_v62 = vsel %vm1590_vm14, %v3281_v24, 0 }
 0x1c7   : > { %v1757_v49 = vadd.f32 %v3247_v23, %v1756_v37  ;;  %v1856_v19 = vmax.f32 %v1754_v11, 0.0 }
 0x1c8   : > { %v1859_v55 = vmax.f32 %v1765_v16, 0.0 }
 0x1c9   : > { %v1857_v40 = vmax.f32 %v1757_v49, 0.0 }
 0x1ca   : > { %v3289_v41 = vpack.c.bf16 %v1859_v55, %v1858_v50 }
 0x1cb   : > { %v3291_v44 = vpack.c.bf16 %v1857_v40, %v1856_v19 }
 0x1cd   : > { %v1919_v24 = vsel %vm1590_vm14, %v3291_v44, 0 }
 0x1e3   : > { %v2241_v36 = vpop.f32.mrb[12].mxu0 }
 0x1e4   : > { %v1778_v34 = vadd.f32 %v2241_v36, %v3247_v23  ;;  %v1769_v21 = vpop.f32.mrb[13].mxu0 }
 0x1e5   : > { %v1770_v4 = vadd.f32 %v3247_v23, %v1769_v21  ;;  %v2242_v43 = vpop.f32.mrb[14].mxu0 }
 0x1e6   : > { %v1781_v6 = vadd.f32 %v2242_v43, %v3247_v23  ;;  %v1772_v28 = vpop.f32.mrb[15].mxu0  ;;  %v1862_v8 = vmax.f32 %v1778_v34, 0.0 }
 0x1e7   : > { %v1773_v15 = vadd.f32 %v3247_v23, %v1772_v28  ;;  %v1860_v35 = vmax.f32 %v1770_v4, 0.0  ;;  %v1922_v4 = vsel %vm1590_vm14, %v3289_v41, 0 }
 0x1e8   : > { %v1863_v18 = vmax.f32 %v1781_v6, 0.0 }
 0x1e9   : > { %v1861_v54 = vmax.f32 %v1773_v15, 0.0 }
 0x1ea   : > { %v3297_v39 = vpack.c.bf16 %v1863_v18, %v1862_v8 }
 0x1eb   : > { %v3299_v10 = vpack.c.bf16 %v1861_v54, %v1860_v35 }
 0x200   : > { %v2245_v58 = vpop.f32.mrb[16].mxu0 }
 0x201   : > { %v1794_v1 = vadd.f32 %v2245_v58, %v3247_v23  ;;  %v1785_v61 = vpop.f32.mrb[17].mxu0 }
 0x202   : > { %v1786_v63 = vadd.f32 %v3247_v23, %v1785_v61  ;;  %v2246_v31 = vpop.f32.mrb[18].mxu0  ;;  %v1925_v61 = vsel %vm1590_vm14, %v3299_v10, 0 }
 0x203   : > { %v1797_v2 = vadd.f32 %v2246_v31, %v3247_v23  ;;  %v1788_v9 = vpop.f32.mrb[19].mxu0  ;;  %v1866_v42 = vmax.f32 %v1794_v1, 0.0 }
 0x204   : > { %v1789_v26 = vadd.f32 %v3247_v23, %v1788_v9  ;;  %v1864_v13 = vmax.f32 %v1786_v63, 0.0  ;;  %v1928_v63 = vsel %vm1590_vm14, %v3297_v39, 0 }
 0x205   : > { %v1867_v45 = vmax.f32 %v1797_v2, 0.0 }
 0x206   : > { %v1865_v14 = vmax.f32 %v1789_v26, 0.0 }
 0x207   : > { %v1890_v32 = vpack.c.bf16 %v1867_v45, %v1866_v42 }
 0x208   : > { %v1889_v33 = vpack.c.bf16 %v1865_v14, %v1864_v13 }
 0x20a   : > { %2260 = vmatprep.subr.msk.bf16.mxu1 %vm1590_vm14, %v1889_v33 }
 0x20b   : > { %2204 = vmatpush3.bf16.xpose.msra.mxu1 %v1907_v51 }
 0x20c   : > { %2261 = vmatprep.subr.msk.bf16.mxu1 %vm1590_vm14, %v1890_v32 }
 0x213   : > { %2206 = vmatpush3.bf16.xpose.msra.mxu1 %v1910_v53 }
 0x220   : > { %v2249_v57 = vpop.f32.mrb[20].mxu0 }
 0x221   : > { %v1810_v17 = vadd.f32 %v2249_v57, %v3247_v23  ;;  %v1801_v7 = vpop.f32.mrb[21].mxu0 }
 0x222   : > { %v1802_v22 = vadd.f32 %v3247_v23, %v1801_v7  ;;  %v2250_v29 = vpop.f32.mrb[22].mxu0 }
 0x223   : > { %v1813_v56 = vadd.f32 %v2250_v29, %v3247_v23  ;;  %v1804_v60 = vpop.f32.mrb[23].mxu0  ;;  %v1870_v46 = vmax.f32 %v1810_v17, 0.0 }
 0x224   : > { %v1805_v3 = vadd.f32 %v3247_v23, %v1804_v60  ;;  %v1868_v0 = vmax.f32 %v1802_v22, 0.0 }
 0x225   : > { %v1871_v5 = vmax.f32 %v1813_v56, 0.0 }
 0x226   : > { %v1869_v38 = vmax.f32 %v1805_v3, 0.0 }
 0x227   : > { %v1892_v48 = vpack.c.bf16 %v1871_v5, %v1870_v46 }
 0x228   : > { %v1891_v20 = vpack.c.bf16 %v1869_v38, %v1868_v0 }
 0x22a   : > { %2262 = vmatprep.subr.msk.bf16.mxu1 %vm1590_vm14, %v1891_v20 }
 0x22b   : > { %2208 = vmatpush3.bf16.xpose.msra.mxu1 %v1913_v12 }
 0x22c   : > { %2263 = vmatprep.subr.msk.bf16.mxu1 %vm1590_vm14, %v1892_v48 }
 0x233   : > { %2210 = vmatpush3.bf16.xpose.msra.mxu1 %v1916_v62 }
 0x240   : > { %v2253_v30 = vpop.f32.mrb[24].mxu0 }
 0x241   : > { %v1826_v11 = vadd.f32 %v2253_v30, %v3247_v23  ;;  %v1817_v25 = vpop.f32.mrb[25].mxu0 }
 0x242   : > { %v1818_v16 = vadd.f32 %v3247_v23, %v1817_v25  ;;  %v2254_v37 = vpop.f32.mrb[26].mxu0 }
 0x243   : > { %v1829_v49 = vadd.f32 %v2254_v37, %v3247_v23  ;;  %v1820_v50 = vpop.f32.mrb[27].mxu0  ;;  %v1874_v27 = vmax.f32 %v1826_v11, 0.0 }
 0x244   : > { %v1821_v55 = vadd.f32 %v3247_v23, %v1820_v50  ;;  %v1872_v40 = vmax.f32 %v1818_v16, 0.0 }
 0x245   : > { %v1875_v19 = vmax.f32 %v1829_v49, 0.0 }
 0x246   : > { %v1873_v36 = vmax.f32 %v1821_v55, 0.0 }
 0x247   : > { %v1894_v34 = vpack.c.bf16 %v1875_v19, %v1874_v27 }
 0x248   : > { %v1893_v21 = vpack.c.bf16 %v1873_v36, %v1872_v40 }
 0x24a   : > { %2264 = vmatprep.subr.msk.bf16.mxu1 %vm1590_vm14, %v1893_v21 }
 0x24b   : > { %2212 = vmatpush3.bf16.xpose.msra.mxu1 %v1919_v24 }
 0x24c   : > { %2265 = vmatprep.subr.msk.bf16.mxu1 %vm1590_vm14, %v1894_v34 }
 0x253   : > { %2214 = vmatpush3.bf16.xpose.msra.mxu1 %v1922_v4 }
 0x260   : > { %v2257_v43 = vpop.f32.mrb[28].mxu0 }
 0x261   : > { %v1842_v6 = vadd.f32 %v2257_v43, %v3247_v23  ;;  %v1833_v28 = vpop.f32.mrb[29].mxu0 }
 0x262   : > { %v1834_v15 = vadd.f32 %v3247_v23, %v1833_v28  ;;  %v2258_v8 = vpop.f32.mrb[30].mxu0 }
 0x263   : > { %v1845_v18 = vadd.f32 %v2258_v8, %v3247_v23  ;;  %v1836_v35 = vpop.f32.mrb[31].mxu0  ;;  %v1878_v54 = vmax.f32 %v1842_v6, 0.0 }
 0x264   : > { %v1837_v44 = vadd.f32 %v3247_v23, %v1836_v35  ;;  %v1876_v59 = vmax.f32 %v1834_v15, 0.0  ;;  %v1901_v23 = vpop.permute.xlu0 %1900 }
 0x265   : > { %v1879_v52 = vmax.f32 %v1845_v18, 0.0 }
 0x266   : > { %v1877_v58 = vmax.f32 %v1837_v44, 0.0 }
 0x267   : > { %v1896_v1 = vpack.c.bf16 %v1879_v52, %v1878_v54 }
 0x268   : > { %v1895_v41 = vpack.c.bf16 %v1877_v58, %v1876_v59 }
 0x26a   : > { %2266 = vmatprep.subr.msk.bf16.mxu1 %vm1590_vm14, %v1895_v41 }
 0x26b   : > { %2216 = vmatpush3.bf16.xpose.msra.mxu1 %v1925_v61 }
 0x26c   : > { %2267 = vmatprep.subr.msk.bf16.mxu1 %vm1590_vm14, %v1896_v1 }
 0x273   : > { %2218 = vmatpush3.bf16.xpose.msra.mxu1 %v1928_v63 }
 0x27a   : > { %2220 = vmatmul.mubr.msk.bf16.vlgmr.msra.gmra.mrb[0].mxu1 %vm1590_vm14, %v3304_v47 }
 0x34d   : > { %v1988_v31 = vpop.f32.mrb[0].mxu1 }
 0x34e   : > { %v1989_v2 = vadd.f32 %v1988_v31, %v1901_v23  ;;  %v1990_v9 = vpop.f32.mrb[1].mxu1 }
 0x34f   : > { %v1991_v10 = vadd.f32 %v1990_v9, %v1901_v23  ;;  %v1992_v26 = vpop.f32.mrb[2].mxu1 }
 0x350   : > { %1995 = vst [vmem:[%s246_s28] sm:$0xff] %v1989_v2  ;;  %v1993_v42 = vpop.f32.mrb[3].mxu1 }
 0x351   : > { %1996 = vst [vmem:[%s246_s28 + $0x8] sm:$0xff] %v1991_v10 }
 0x352 PF: > { %s15_s20 = sadd.s32 1, %s2346_s20   ;;  %s3376_s18 = smov %s2342_s19 }
 0x353   : > { %p12_p5 = scmp.ge.s32.totalorder %s15_s20, 4   ;;  %s3377_s19 = smov %s3379_s21 }
 0x355   :  { %14 = sbr.rel (!%p12_p5) target bundleno = 2 (0x2), region = 71 }

</bundles_post_ra>
